<compile_context>
chip_gen: v7x
topology: tpu7x:2x2x1
jax: 0.10.0
libtpu: 0.0.40
codegen_flags: <defaults>
</compile_context>

<pallas_src>
import functools
import math

import jax
import jax.numpy as jnp
from jax import lax
from jax.experimental import pallas as pl
from jax.experimental.pallas import tpu as pltpu

# ------------------------- model config (small) -------------------------
D_MODEL = 32
N_LAYER = 2
VOCAB = 64
D_STATE = 16
D_CONV = 4
EXPAND = 2
D_INNER = EXPAND * D_MODEL                      # 64
DT_RANK = math.ceil(D_MODEL / 16)               # 2
EPS = 1e-5


# ------------------------------ kernel ----------------------------------
def _mixer_kernel(h_emb_ref, norm_w_ref, norm_b_ref, w_in_ref,
                  conv_w_ref, conv_b_ref, w_dt_ref, w_bc_ref, dt_bias_ref,
                  neg_a_ref, d_ref, w_out_ref, normf_w_ref, normf_b_ref,
                  out_ref, h_scr, res_scr,
                  *, seqlen, d_inner, d_state, d_conv, eps):
    """One grid step = one (batch element, layer).  h/res carried in VMEM."""
    f32 = jnp.float32
    layer = pl.program_id(1)
    n_layer = pl.num_programs(1)

    def layernorm(x, w, b):
        mean = jnp.mean(x, axis=-1, keepdims=True)
        xc = x - mean
        var = jnp.mean(xc * xc, axis=-1, keepdims=True)
        return xc * lax.rsqrt(var + eps) * w + b

    def sigmoid(v):                          # one EUP op (tanh) per element
        return 0.5 * (1.0 + jnp.tanh(0.5 * v))

    # ---- layer 0: load embedding rows for this sequence, zero residual ----
    @pl.when(layer == 0)
    def _():
        h_scr[...] = h_emb_ref[...]
        res_scr[...] = jnp.zeros_like(res_scr)

    # ---- residual add + LayerNorm (prenorm; residual carried forward) ----
    x_in = h_scr[...] + res_scr[...]                    # (L, d_model)
    res_scr[...] = x_in
    normed = layernorm(x_in, norm_w_ref[...], norm_b_ref[...])

    # ---- in_proj: single 128-lane-wide matmul, slice x / z ----------------
    xz = jnp.dot(normed, w_in_ref[...], preferred_element_type=f32)  # (L, 128)
    x = xz[:, :d_inner]                                  # (L, d_inner)
    z = xz[:, d_inner:]                                  # (L, d_inner)

    # ---- depthwise causal conv1d + SiLU (static sublane shifts) -----------
    w_conv = conv_w_ref[...]                             # (d_conv, d_inner)
    acc = x * w_conv[d_conv - 1:d_conv, :] + conv_b_ref[...]     # tap shift 0
    for s in range(1, d_conv):                           # static, d_conv = 4
        shifted = jnp.concatenate(
            [jnp.zeros((s, d_inner), f32), x[:seqlen - s, :]], axis=0)
        acc = acc + shifted * w_conv[d_conv - 1 - s:d_conv - s, :]
    x_conv = acc * sigmoid(acc)                          # SiLU

    # ---- x_proj: dt (dt_proj folded in) + B/C in scan-native layout -------
    dt = jnp.dot(x_conv, w_dt_ref[...], preferred_element_type=f32)  # (L, d_inner)
    nt_dims = (((1,), (1,)), ((), ()))                   # contract d_inner
    bc_t = lax.dot_general(w_bc_ref[...], x_conv, nt_dims,
                           preferred_element_type=f32)   # (2*d_state, L)

    xdt = dt + dt_bias_ref[...]
    # numerically stable softplus
    delta = jnp.maximum(xdt, 0.0) + jnp.log(1.0 + jnp.exp(-jnp.abs(xdt)))
    du = delta * x_conv                                  # delta * u  (L, d_inner)

    # ---- selective scan ----------------------------------------------------
    neg_a = neg_a_ref[...]                               # (d_state, d_inner) = -exp(A_log).T
    # Bulk-hoisted decay: one EUP burst over (L*d_state, d_inner).
    decay_all = jnp.exp(jnp.concatenate(
        [delta[i:i + 1, :] * neg_a for i in range(seqlen)], axis=0))

    state = jnp.zeros((d_state, d_inner), f32)
    ys = []
    for i in range(seqlen):                              # static (seqlen = 8)
        b_col = bc_t[:d_state, i:i + 1]                  # (d_state, 1)
        c_col = bc_t[d_state:, i:i + 1]                  # (d_state, 1)
        state = (decay_all[i * d_state:(i + 1) * d_state, :] * state
                 + b_col * du[i:i + 1, :])
        ys.append(jnp.sum(c_col * state, axis=0, keepdims=True))  # (1, d_inner)
    y = jnp.concatenate(ys, axis=0)                      # (L, d_inner), one block

    # ---- D skip, SiLU(z) gate, out_proj ------------------------------------
    y = y + x_conv * d_ref[...]
    y = y * (z * sigmoid(z))
    h_scr[...] = jnp.dot(y, w_out_ref[...], preferred_element_type=f32)

    # ---- last layer: final add + norm_f, write the single output ----------
    @pl.when(layer == n_layer - 1)
    def _():
        xf = h_scr[...] + res_scr[...]
        out_ref[...] = layernorm(xf, normf_w_ref[...], normf_b_ref[...])


# ----------------------------- wrapper ------------------------------------
def _stacked_spec(arr):
    """Per-layer weight stacked on a leading layer axis; pick slice `l`."""
    return pl.BlockSpec((None,) + arr.shape[1:], lambda b, l: (l, 0, 0))


def mixer_model_forward(params, input_ids):
    """input_ids: (B, L) int32 -> (B, L, d_model)."""
    batch, seqlen = input_ids.shape
    # embedding gather stays in plain JAX (tiny table)
    h = jnp.take(params["embedding"], input_ids.reshape(-1), axis=0)
    h = h.reshape(batch, seqlen, D_MODEL)

    lw = params["layers"]          # dict of (N_LAYER, ...) stacked weights
    kernel = functools.partial(
        _mixer_kernel, seqlen=seqlen, d_inner=D_INNER, d_state=D_STATE,
        d_conv=D_CONV, eps=EPS)

    in_specs = [
        pl.BlockSpec((None, seqlen, D_MODEL), lambda b, l: (b, 0, 0)),  # h_emb
        _stacked_spec(lw["norm_w"]),
        _stacked_spec(lw["norm_b"]),
        _stacked_spec(lw["w_in"]),
        _stacked_spec(lw["conv_w_t"]),
        _stacked_spec(lw["conv_b"]),
        _stacked_spec(lw["w_dt"]),
        _stacked_spec(lw["w_bc"]),
        _stacked_spec(lw["dt_bias"]),
        _stacked_spec(lw["neg_A_t"]),
        _stacked_spec(lw["D"]),
        _stacked_spec(lw["w_out"]),
        pl.BlockSpec((1, D_MODEL), lambda b, l: (0, 0)),                # norm_f w
        pl.BlockSpec((1, D_MODEL), lambda b, l: (0, 0)),                # norm_f b
    ]
    out_spec = pl.BlockSpec((None, seqlen, D_MODEL), lambda b, l: (b, 0, 0))

    out = pl.pallas_call(
        kernel,
        out_shape=jax.ShapeDtypeStruct((batch, seqlen, D_MODEL), jnp.float32),
        grid_spec=pltpu.PrefetchScalarGridSpec(
            num_scalar_prefetch=0,
            grid=(batch, N_LAYER),
            in_specs=in_specs,
            out_specs=out_spec,
            scratch_shapes=[pltpu.VMEM((seqlen, D_MODEL), jnp.float32),   # h
                            pltpu.VMEM((seqlen, D_MODEL), jnp.float32)],  # res
        ),
        compiler_params=pltpu.CompilerParams(
            dimension_semantics=("parallel", "arbitrary")),
    )(h, lw["norm_w"], lw["norm_b"], lw["w_in"], lw["conv_w_t"], lw["conv_b"],
      lw["w_dt"], lw["w_bc"], lw["dt_bias"], lw["neg_A_t"], lw["D"],
      lw["w_out"], params["norm_f_w"], params["norm_f_b"])
    return out


# ------------------------- deterministic init ----------------------------
def init_params(key):
    keys = jax.random.split(key, 1 + N_LAYER)
    params = {
        "embedding": jax.random.normal(keys[0], (VOCAB, D_MODEL),
                                       jnp.float32) * 0.02,
        "norm_f_w": jnp.ones((1, D_MODEL), jnp.float32),
        "norm_f_b": jnp.zeros((1, D_MODEL), jnp.float32),
    }
    per_layer = {k: [] for k in
                 ["norm_w", "norm_b", "w_in", "conv_w_t", "conv_b", "w_dt",
                  "w_bc", "dt_bias", "neg_A_t", "D", "w_out"]}
    for i in range(N_LAYER):
        k = jax.random.split(keys[1 + i], 7)
        # PyTorch-layout parameters ...
        in_proj_w = jax.random.normal(k[0], (2 * D_INNER, D_MODEL),
                                      jnp.float32) / math.sqrt(D_MODEL)
        conv_w = jax.random.normal(k[1], (D_INNER, D_CONV),
                                   jnp.float32) / math.sqrt(D_CONV)
        conv_b = jax.random.normal(k[2], (1, D_INNER), jnp.float32) * 0.1
        x_proj_w = jax.random.normal(k[3], (DT_RANK + 2 * D_STATE, D_INNER),
                                     jnp.float32) / math.sqrt(D_INNER)
        dt_proj_w = jax.random.normal(k[4], (D_INNER, DT_RANK),
                                      jnp.float32) / math.sqrt(DT_RANK)
        # bias ~ softplus-inverse of small dt (keeps exp() well-behaved)
        dt_proj_b = jax.random.uniform(k[5], (1, D_INNER), jnp.float32,
                                       minval=-4.0, maxval=-2.0)
        out_proj_w = jax.random.normal(k[6], (D_MODEL, D_INNER),
                                       jnp.float32) / math.sqrt(D_INNER)
        a_log = jnp.log(jnp.tile(
            jnp.arange(1, D_STATE + 1, dtype=jnp.float32)[None, :],
            (D_INNER, 1)))                                   # (d_inner, d_state)

        # ... converted once, at init, into kernel-native layouts.
        per_layer["norm_w"].append(jnp.ones((1, D_MODEL), jnp.float32))
        per_layer["norm_b"].append(jnp.zeros((1, D_MODEL), jnp.float32))
        per_layer["w_in"].append(in_proj_w.T)                # (d_model, 2*d_inner)
        per_layer["conv_w_t"].append(conv_w.T)               # (d_conv, d_inner)
        per_layer["conv_b"].append(conv_b)                   # (1, d_inner)
        # dt_proj folded into x_proj:  dt_full = x @ W_dt
        per_layer["w_dt"].append(x_proj_w[:DT_RANK].T @ dt_proj_w.T)  # (d_inner, d_inner)
        per_layer["w_bc"].append(x_proj_w[DT_RANK:])         # (2*d_state, d_inner)
        per_layer["dt_bias"].append(dt_proj_b)               # (1, d_inner)
        per_layer["neg_A_t"].append(-jnp.exp(a_log).T)       # (d_state, d_inner) = A.T
        per_layer["D"].append(jnp.ones((1, D_INNER), jnp.float32))
        per_layer["w_out"].append(out_proj_w.T)              # (d_inner, d_model)

    params["layers"] = {name: jnp.stack(vals, axis=0)
                        for name, vals in per_layer.items()}
    return params


# --------------------------------- main -----------------------------------
if __name__ == "__main__":
    key = jax.random.PRNGKey(0)
    pkey, ikey = jax.random.split(key)
    params = init_params(pkey)

    batch, seqlen = 2, 8
    input_ids = jax.random.randint(ikey, (batch, seqlen), 0, VOCAB,
                                   dtype=jnp.int32)

    fwd = jax.jit(mixer_model_forward)
    out = jax.block_until_ready(fwd(params, input_ids))

    assert out.shape == (batch, seqlen, D_MODEL)
    assert bool(jnp.all(jnp.isfinite(out)))
    print("KERNEL_OK")
</pallas_src>

<mosaic_0001>
module attributes {stable_mosaic.version = 11 : i64} {
  func.func @_mixer_kernel(%arg0: i32, %arg1: i32, %arg2: memref<1x8x32xf32, #tpu.memory_space<vmem>>, %arg3: memref<1x1x32xf32, #tpu.memory_space<vmem>>, %arg4: memref<1x1x32xf32, #tpu.memory_space<vmem>>, %arg5: memref<1x32x128xf32, #tpu.memory_space<vmem>>, %arg6: memref<1x4x64xf32, #tpu.memory_space<vmem>>, %arg7: memref<1x1x64xf32, #tpu.memory_space<vmem>>, %arg8: memref<1x64x64xf32, #tpu.memory_space<vmem>>, %arg9: memref<1x32x64xf32, #tpu.memory_space<vmem>>, %arg10: memref<1x1x64xf32, #tpu.memory_space<vmem>>, %arg11: memref<1x16x64xf32, #tpu.memory_space<vmem>>, %arg12: memref<1x1x64xf32, #tpu.memory_space<vmem>>, %arg13: memref<1x64x32xf32, #tpu.memory_space<vmem>>, %arg14: memref<1x32xf32, #tpu.memory_space<vmem>>, %arg15: memref<1x32xf32, #tpu.memory_space<vmem>>, %arg16: memref<1x8x32xf32, #tpu.memory_space<vmem>>, %arg17: memref<8x32xf32, #tpu.memory_space<vmem>>, %arg18: memref<8x32xf32, #tpu.memory_space<vmem>>) attributes {dimension_semantics = [#tpu.dimension_semantics<parallel>, #tpu.dimension_semantics<arbitrary>], iteration_bounds = array<i64: 2, 2>, scalar_prefetch = 0 : i64, scratch_operands = 2 : i64, tpu.core_type = #tpu.core_type<tc>, window_params = [{transform_indices = @transform_0, window_bounds = array<i64: 1, 8, 32>}, {transform_indices = @transform_1, window_bounds = array<i64: 1, 1, 32>}, {transform_indices = @transform_2, window_bounds = array<i64: 1, 1, 32>}, {transform_indices = @transform_3, window_bounds = array<i64: 1, 32, 128>}, {transform_indices = @transform_4, window_bounds = array<i64: 1, 4, 64>}, {transform_indices = @transform_5, window_bounds = array<i64: 1, 1, 64>}, {transform_indices = @transform_6, window_bounds = array<i64: 1, 64, 64>}, {transform_indices = @transform_7, window_bounds = array<i64: 1, 32, 64>}, {transform_indices = @transform_8, window_bounds = array<i64: 1, 1, 64>}, {transform_indices = @transform_9, window_bounds = array<i64: 1, 16, 64>}, {transform_indices = @transform_10, window_bounds = array<i64: 1, 1, 64>}, {transform_indices = @transform_11, window_bounds = array<i64: 1, 64, 32>}, {pipeline_mode = #tpu.pipeline_mode<synchronous>, transform_indices = @transform_12, window_bounds = array<i64: 1, 32>}, {pipeline_mode = #tpu.pipeline_mode<synchronous>, transform_indices = @transform_13, window_bounds = array<i64: 1, 32>}, {transform_indices = @transform_14, window_bounds = array<i64: 1, 8, 32>}]} {
    %c0_i32 = arith.constant 0 : i32
    %0 = arith.cmpi eq, %arg1, %c0_i32 : i32
    %1 = arith.extui %0 : i1 to i32
    %c0_i32_0 = arith.constant 0 : i32
    %2 = arith.cmpi ne, %1, %c0_i32_0 : i32
    scf.if %2 {
      %c0_71 = arith.constant 0 : index
      %c0_72 = arith.constant 0 : index
      %c0_73 = arith.constant 0 : index
      %250 = vector.load %arg2[%c0_71, %c0_72, %c0_73] : memref<1x8x32xf32, #tpu.memory_space<vmem>>, vector<1x8x32xf32>
      %251 = vector.shape_cast %250 : vector<1x8x32xf32> to vector<8x32xf32>
      %c0_74 = arith.constant 0 : index
      %c0_75 = arith.constant 0 : index
      %252 = vector.load %arg17[%c0_74, %c0_75] : memref<8x32xf32, #tpu.memory_space<vmem>>, vector<8x32xf32>
      tpu.vector_store %arg17[%c0_74, %c0_75], %251 {strides = array<i32>} : memref<8x32xf32, #tpu.memory_space<vmem>>, vector<8x32xf32>,
      %cst_76 = arith.constant 0.000000e+00 : f32
      %253 = vector.broadcast %cst_76 : f32 to vector<8x32xf32>
      %c0_77 = arith.constant 0 : index
      %c0_78 = arith.constant 0 : index
      %254 = vector.load %arg18[%c0_77, %c0_78] : memref<8x32xf32, #tpu.memory_space<vmem>>, vector<8x32xf32>
      tpu.vector_store %arg18[%c0_77, %c0_78], %253 {strides = array<i32>} : memref<8x32xf32, #tpu.memory_space<vmem>>, vector<8x32xf32>,
    } else {
    }
    %c0 = arith.constant 0 : index
    %c0_1 = arith.constant 0 : index
    %3 = vector.load %arg17[%c0, %c0_1] : memref<8x32xf32, #tpu.memory_space<vmem>>, vector<8x32xf32>
    %c0_2 = arith.constant 0 : index
    %c0_3 = arith.constant 0 : index
    %4 = vector.load %arg18[%c0_2, %c0_3] : memref<8x32xf32, #tpu.memory_space<vmem>>, vector<8x32xf32>
    %5 = arith.addf %3, %4 : vector<8x32xf32>
    %c0_4 = arith.constant 0 : index
    %c0_5 = arith.constant 0 : index
    %6 = vector.load %arg18[%c0_4, %c0_5] : memref<8x32xf32, #tpu.memory_space<vmem>>, vector<8x32xf32>
    tpu.vector_store %arg18[%c0_4, %c0_5], %5 {strides = array<i32>} : memref<8x32xf32, #tpu.memory_space<vmem>>, vector<8x32xf32>,
    %c0_6 = arith.constant 0 : index
    %c0_7 = arith.constant 0 : index
    %c0_8 = arith.constant 0 : index
    %7 = vector.load %arg3[%c0_6, %c0_7, %c0_8] : memref<1x1x32xf32, #tpu.memory_space<vmem>>, vector<1x1x32xf32>
    %8 = vector.shape_cast %7 : vector<1x1x32xf32> to vector<1x32xf32>
    %c0_9 = arith.constant 0 : index
    %c0_10 = arith.constant 0 : index
    %c0_11 = arith.constant 0 : index
    %9 = vector.load %arg4[%c0_9, %c0_10, %c0_11] : memref<1x1x32xf32, #tpu.memory_space<vmem>>, vector<1x1x32xf32>
    %10 = vector.shape_cast %9 : vector<1x1x32xf32> to vector<1x32xf32>
    %cst = arith.constant dense<0.000000e+00> : vector<8xf32>
    %11 = vector.multi_reduction <add>, %5, %cst [1] : vector<8x32xf32> to vector<8xf32>
    %12 = vector.shape_cast %11 : vector<8xf32> to vector<8x1xf32>
    %cst_12 = arith.constant 3.200000e+01 : f32
    %13 = vector.broadcast %cst_12 : f32 to vector<8x1xf32>
    %14 = arith.divf %12, %13 : vector<8x1xf32>
    %15 = vector.broadcast %14 : vector<8x1xf32> to vector<8x32xf32>
    %16 = arith.subf %5, %15 : vector<8x32xf32>
    %17 = arith.mulf %16, %16 : vector<8x32xf32>
    %cst_13 = arith.constant dense<0.000000e+00> : vector<8xf32>
    %18 = vector.multi_reduction <add>, %17, %cst_13 [1] : vector<8x32xf32> to vector<8xf32>
    %19 = vector.shape_cast %18 : vector<8xf32> to vector<8x1xf32>
    %cst_14 = arith.constant 3.200000e+01 : f32
    %20 = vector.broadcast %cst_14 : f32 to vector<8x1xf32>
    %21 = arith.divf %19, %20 : vector<8x1xf32>
    %cst_15 = arith.constant 9.99999974E-6 : f32
    %22 = vector.broadcast %cst_15 : f32 to vector<8x1xf32>
    %23 = arith.addf %21, %22 : vector<8x1xf32>
    %24 = math.rsqrt %23 : vector<8x1xf32>
    %25 = vector.broadcast %24 : vector<8x1xf32> to vector<8x32xf32>
    %26 = arith.mulf %16, %25 : vector<8x32xf32>
    %27 = vector.broadcast %8 : vector<1x32xf32> to vector<8x32xf32>
    %28 = arith.mulf %26, %27 : vector<8x32xf32>
    %29 = vector.broadcast %10 : vector<1x32xf32> to vector<8x32xf32>
    %30 = arith.addf %28, %29 : vector<8x32xf32>
    %c0_16 = arith.constant 0 : index
    %c0_17 = arith.constant 0 : index
    %c0_18 = arith.constant 0 : index
    %31 = vector.load %arg5[%c0_16, %c0_17, %c0_18] : memref<1x32x128xf32, #tpu.memory_space<vmem>>, vector<1x32x128xf32>
    %32 = vector.shape_cast %31 : vector<1x32x128xf32> to vector<32x128xf32>
    %cst_19 = arith.constant dense<0.000000e+00> : vector<8x128xf32>
    %33 = tpu.matmul %30, %32, %cst_19 {dimension_numbers = #tpu.dot_dimension_numbers<[1], [0], [0], [1], [0, 0, 1, 1], [], []>} : vector<8x32xf32>, vector<32x128xf32>, vector<8x128xf32> -> vector<8x128xf32>
    %34 = vector.extract_strided_slice %33 {offsets = [0, 0], sizes = [8, 64], strides = [1, 1]} : vector<8x128xf32> to vector<8x64xf32>
    %35 = vector.extract_strided_slice %33 {offsets = [0, 64], sizes = [8, 64], strides = [1, 1]} : vector<8x128xf32> to vector<8x64xf32>
    %c0_20 = arith.constant 0 : index
    %c0_21 = arith.constant 0 : index
    %c0_22 = arith.constant 0 : index
    %36 = vector.load %arg6[%c0_20, %c0_21, %c0_22] : memref<1x4x64xf32, #tpu.memory_space<vmem>>, vector<1x4x64xf32>
    %37 = vector.shape_cast %36 : vector<1x4x64xf32> to vector<4x64xf32>
    %38 = vector.extract_strided_slice %37 {offsets = [3, 0], sizes = [1, 64], strides = [1, 1]} : vector<4x64xf32> to vector<1x64xf32>
    %39 = vector.broadcast %38 : vector<1x64xf32> to vector<8x64xf32>
    %40 = arith.mulf %34, %39 : vector<8x64xf32>
    %c0_23 = arith.constant 0 : index
    %c0_24 = arith.constant 0 : index
    %c0_25 = arith.constant 0 : index
    %41 = vector.load %arg7[%c0_23, %c0_24, %c0_25] : memref<1x1x64xf32, #tpu.memory_space<vmem>>, vector<1x1x64xf32>
    %42 = vector.shape_cast %41 : vector<1x1x64xf32> to vector<1x64xf32>
    %43 = vector.broadcast %42 : vector<1x64xf32> to vector<8x64xf32>
    %44 = arith.addf %40, %43 : vector<8x64xf32>
    %cst_26 = arith.constant 0.000000e+00 : f32
    %45 = vector.broadcast %cst_26 : f32 to vector<1x64xf32>
    %46 = vector.extract_strided_slice %34 {offsets = [0, 0], sizes = [7, 64], strides = [1, 1]} : vector<8x64xf32> to vector<7x64xf32>
    %47 = tpu.concatenate %45, %46 in 0 : vector<1x64xf32>, vector<7x64xf32> -> vector<8x64xf32>
    %48 = vector.extract_strided_slice %37 {offsets = [2, 0], sizes = [1, 64], strides = [1, 1]} : vector<4x64xf32> to vector<1x64xf32>
    %49 = vector.broadcast %48 : vector<1x64xf32> to vector<8x64xf32>
    %50 = arith.mulf %47, %49 : vector<8x64xf32>
    %51 = arith.addf %44, %50 : vector<8x64xf32>
    %cst_27 = arith.constant 0.000000e+00 : f32
    %52 = vector.broadcast %cst_27 : f32 to vector<2x64xf32>
    %53 = vector.extract_strided_slice %34 {offsets = [0, 0], sizes = [6, 64], strides = [1, 1]} : vector<8x64xf32> to vector<6x64xf32>
    %54 = tpu.concatenate %52, %53 in 0 : vector<2x64xf32>, vector<6x64xf32> -> vector<8x64xf32>
    %55 = vector.extract_strided_slice %37 {offsets = [1, 0], sizes = [1, 64], strides = [1, 1]} : vector<4x64xf32> to vector<1x64xf32>
    %56 = vector.broadcast %55 : vector<1x64xf32> to vector<8x64xf32>
    %57 = arith.mulf %54, %56 : vector<8x64xf32>
    %58 = arith.addf %51, %57 : vector<8x64xf32>
    %cst_28 = arith.constant 0.000000e+00 : f32
    %59 = vector.broadcast %cst_28 : f32 to vector<3x64xf32>
    %60 = vector.extract_strided_slice %34 {offsets = [0, 0], sizes = [5, 64], strides = [1, 1]} : vector<8x64xf32> to vector<5x64xf32>
    %61 = tpu.concatenate %59, %60 in 0 : vector<3x64xf32>, vector<5x64xf32> -> vector<8x64xf32>
    %62 = vector.extract_strided_slice %37 {offsets = [0, 0], sizes = [1, 64], strides = [1, 1]} : vector<4x64xf32> to vector<1x64xf32>
    %63 = vector.broadcast %62 : vector<1x64xf32> to vector<8x64xf32>
    %64 = arith.mulf %61, %63 : vector<8x64xf32>
    %65 = arith.addf %58, %64 : vector<8x64xf32>
    %cst_29 = arith.constant 5.000000e-01 : f32
    %66 = vector.broadcast %cst_29 : f32 to vector<8x64xf32>
    %67 = arith.mulf %66, %65 : vector<8x64xf32>
    %68 = math.tanh %67 : vector<8x64xf32>
    %cst_30 = arith.constant 1.000000e+00 : f32
    %69 = vector.broadcast %cst_30 : f32 to vector<8x64xf32>
    %70 = arith.addf %69, %68 : vector<8x64xf32>
    %cst_31 = arith.constant 5.000000e-01 : f32
    %71 = vector.broadcast %cst_31 : f32 to vector<8x64xf32>
    %72 = arith.mulf %71, %70 : vector<8x64xf32>
    %73 = arith.mulf %65, %72 : vector<8x64xf32>
    %c0_32 = arith.constant 0 : index
    %c0_33 = arith.constant 0 : index
    %c0_34 = arith.constant 0 : index
    %74 = vector.load %arg8[%c0_32, %c0_33, %c0_34] : memref<1x64x64xf32, #tpu.memory_space<vmem>>, vector<1x64x64xf32>
    %75 = vector.shape_cast %74 : vector<1x64x64xf32> to vector<64x64xf32>
    %cst_35 = arith.constant dense<0.000000e+00> : vector<8x64xf32>
    %76 = tpu.matmul %73, %75, %cst_35 {dimension_numbers = #tpu.dot_dimension_numbers<[1], [0], [0], [1], [0, 0, 1, 1], [], []>} : vector<8x64xf32>, vector<64x64xf32>, vector<8x64xf32> -> vector<8x64xf32>
    %c0_36 = arith.constant 0 : index
    %c0_37 = arith.constant 0 : index
    %c0_38 = arith.constant 0 : index
    %77 = vector.load %arg9[%c0_36, %c0_37, %c0_38] : memref<1x32x64xf32, #tpu.memory_space<vmem>>, vector<1x32x64xf32>
    %78 = vector.shape_cast %77 : vector<1x32x64xf32> to vector<32x64xf32>
    %cst_39 = arith.constant dense<0.000000e+00> : vector<32x8xf32>
    %79 = tpu.matmul %78, %73, %cst_39 {dimension_numbers = #tpu.dot_dimension_numbers<[1], [1], [0], [0], [0, 0, 1, 0], [], []>} : vector<32x64xf32>, vector<8x64xf32>, vector<32x8xf32> -> vector<32x8xf32>
    %c0_40 = arith.constant 0 : index
    %c0_41 = arith.constant 0 : index
    %c0_42 = arith.constant 0 : index
    %80 = vector.load %arg10[%c0_40, %c0_41, %c0_42] : memref<1x1x64xf32, #tpu.memory_space<vmem>>, vector<1x1x64xf32>
    %81 = vector.shape_cast %80 : vector<1x1x64xf32> to vector<1x64xf32>
    %82 = vector.broadcast %81 : vector<1x64xf32> to vector<8x64xf32>
    %83 = arith.addf %76, %82 : vector<8x64xf32>
    %cst_43 = arith.constant 0.000000e+00 : f32
    %84 = vector.broadcast %cst_43 : f32 to vector<8x64xf32>
    %85 = arith.maximumf %83, %84 : vector<8x64xf32>
    %86 = math.absf %83 : vector<8x64xf32>
    %cst_44 = arith.constant 0.000000e+00 : f32
    %87 = vector.broadcast %cst_44 : f32 to vector<8x64xf32>
    %88 = arith.subf %87, %86 : vector<8x64xf32>
    %89 = math.exp %88 : vector<8x64xf32>
    %cst_45 = arith.constant 1.000000e+00 : f32
    %90 = vector.broadcast %cst_45 : f32 to vector<8x64xf32>
    %91 = arith.addf %90, %89 : vector<8x64xf32>
    %92 = math.log %91 : vector<8x64xf32>
    %93 = arith.addf %85, %92 : vector<8x64xf32>
    %94 = arith.mulf %93, %73 : vector<8x64xf32>
    %c0_46 = arith.constant 0 : index
    %c0_47 = arith.constant 0 : index
    %c0_48 = arith.constant 0 : index
    %95 = vector.load %arg11[%c0_46, %c0_47, %c0_48] : memref<1x16x64xf32, #tpu.memory_space<vmem>>, vector<1x16x64xf32>
    %96 = vector.shape_cast %95 : vector<1x16x64xf32> to vector<16x64xf32>
    %97 = vector.extract_strided_slice %93 {offsets = [0, 0], sizes = [1, 64], strides = [1, 1]} : vector<8x64xf32> to vector<1x64xf32>
    %98 = vector.broadcast %97 : vector<1x64xf32> to vector<16x64xf32>
    %99 = arith.mulf %98, %96 : vector<16x64xf32>
    %100 = vector.extract_strided_slice %93 {offsets = [1, 0], sizes = [1, 64], strides = [1, 1]} : vector<8x64xf32> to vector<1x64xf32>
    %101 = vector.broadcast %100 : vector<1x64xf32> to vector<16x64xf32>
    %102 = arith.mulf %101, %96 : vector<16x64xf32>
    %103 = vector.extract_strided_slice %93 {offsets = [2, 0], sizes = [1, 64], strides = [1, 1]} : vector<8x64xf32> to vector<1x64xf32>
    %104 = vector.broadcast %103 : vector<1x64xf32> to vector<16x64xf32>
    %105 = arith.mulf %104, %96 : vector<16x64xf32>
    %106 = vector.extract_strided_slice %93 {offsets = [3, 0], sizes = [1, 64], strides = [1, 1]} : vector<8x64xf32> to vector<1x64xf32>
    %107 = vector.broadcast %106 : vector<1x64xf32> to vector<16x64xf32>
    %108 = arith.mulf %107, %96 : vector<16x64xf32>
    %109 = vector.extract_strided_slice %93 {offsets = [4, 0], sizes = [1, 64], strides = [1, 1]} : vector<8x64xf32> to vector<1x64xf32>
    %110 = vector.broadcast %109 : vector<1x64xf32> to vector<16x64xf32>
    %111 = arith.mulf %110, %96 : vector<16x64xf32>
    %112 = vector.extract_strided_slice %93 {offsets = [5, 0], sizes = [1, 64], strides = [1, 1]} : vector<8x64xf32> to vector<1x64xf32>
    %113 = vector.broadcast %112 : vector<1x64xf32> to vector<16x64xf32>
    %114 = arith.mulf %113, %96 : vector<16x64xf32>
    %115 = vector.extract_strided_slice %93 {offsets = [6, 0], sizes = [1, 64], strides = [1, 1]} : vector<8x64xf32> to vector<1x64xf32>
    %116 = vector.broadcast %115 : vector<1x64xf32> to vector<16x64xf32>
    %117 = arith.mulf %116, %96 : vector<16x64xf32>
    %118 = vector.extract_strided_slice %93 {offsets = [7, 0], sizes = [1, 64], strides = [1, 1]} : vector<8x64xf32> to vector<1x64xf32>
    %119 = vector.broadcast %118 : vector<1x64xf32> to vector<16x64xf32>
    %120 = arith.mulf %119, %96 : vector<16x64xf32>
    %121 = tpu.concatenate %99, %102, %105, %108, %111, %114, %117, %120 in 0 : vector<16x64xf32>, vector<16x64xf32>, vector<16x64xf32>, vector<16x64xf32>, vector<16x64xf32>, vector<16x64xf32>, vector<16x64xf32>, vector<16x64xf32> -> vector<128x64xf32>
    %122 = math.exp %121 : vector<128x64xf32>
    %cst_49 = arith.constant 0.000000e+00 : f32
    %123 = vector.broadcast %cst_49 : f32 to vector<16x64xf32>
    %124 = vector.extract_strided_slice %79 {offsets = [0, 0], sizes = [16, 1], strides = [1, 1]} : vector<32x8xf32> to vector<16x1xf32>
    %125 = vector.extract_strided_slice %79 {offsets = [16, 0], sizes = [16, 1], strides = [1, 1]} : vector<32x8xf32> to vector<16x1xf32>
    %126 = vector.extract_strided_slice %122 {offsets = [0, 0], sizes = [16, 64], strides = [1, 1]} : vector<128x64xf32> to vector<16x64xf32>
    %127 = arith.mulf %126, %123 : vector<16x64xf32>
    %128 = vector.extract_strided_slice %94 {offsets = [0, 0], sizes = [1, 64], strides = [1, 1]} : vector<8x64xf32> to vector<1x64xf32>
    %129 = vector.broadcast %124 : vector<16x1xf32> to vector<16x64xf32>
    %130 = vector.broadcast %128 : vector<1x64xf32> to vector<16x64xf32>
    %131 = arith.mulf %129, %130 : vector<16x64xf32>
    %132 = arith.addf %127, %131 : vector<16x64xf32>
    %133 = vector.broadcast %125 : vector<16x1xf32> to vector<16x64xf32>
    %134 = arith.mulf %133, %132 : vector<16x64xf32>
    %cst_50 = arith.constant dense<0.000000e+00> : vector<64xf32>
    %135 = vector.multi_reduction <add>, %134, %cst_50 [0] : vector<16x64xf32> to vector<64xf32>
    %136 = vector.shape_cast %135 : vector<64xf32> to vector<1x64xf32>
    %137 = vector.extract_strided_slice %79 {offsets = [0, 1], sizes = [16, 1], strides = [1, 1]} : vector<32x8xf32> to vector<16x1xf32>
    %138 = vector.extract_strided_slice %79 {offsets = [16, 1], sizes = [16, 1], strides = [1, 1]} : vector<32x8xf32> to vector<16x1xf32>
    %139 = vector.extract_strided_slice %122 {offsets = [16, 0], sizes = [16, 64], strides = [1, 1]} : vector<128x64xf32> to vector<16x64xf32>
    %140 = arith.mulf %139, %132 : vector<16x64xf32>
    %141 = vector.extract_strided_slice %94 {offsets = [1, 0], sizes = [1, 64], strides = [1, 1]} : vector<8x64xf32> to vector<1x64xf32>
    %142 = vector.broadcast %137 : vector<16x1xf32> to vector<16x64xf32>
    %143 = vector.broadcast %141 : vector<1x64xf32> to vector<16x64xf32>
    %144 = arith.mulf %142, %143 : vector<16x64xf32>
    %145 = arith.addf %140, %144 : vector<16x64xf32>
    %146 = vector.broadcast %138 : vector<16x1xf32> to vector<16x64xf32>
    %147 = arith.mulf %146, %145 : vector<16x64xf32>
    %cst_51 = arith.constant dense<0.000000e+00> : vector<64xf32>
    %148 = vector.multi_reduction <add>, %147, %cst_51 [0] : vector<16x64xf32> to vector<64xf32>
    %149 = vector.shape_cast %148 : vector<64xf32> to vector<1x64xf32>
    %150 = vector.extract_strided_slice %79 {offsets = [0, 2], sizes = [16, 1], strides = [1, 1]} : vector<32x8xf32> to vector<16x1xf32>
    %151 = vector.extract_strided_slice %79 {offsets = [16, 2], sizes = [16, 1], strides = [1, 1]} : vector<32x8xf32> to vector<16x1xf32>
    %152 = vector.extract_strided_slice %122 {offsets = [32, 0], sizes = [16, 64], strides = [1, 1]} : vector<128x64xf32> to vector<16x64xf32>
    %153 = arith.mulf %152, %145 : vector<16x64xf32>
    %154 = vector.extract_strided_slice %94 {offsets = [2, 0], sizes = [1, 64], strides = [1, 1]} : vector<8x64xf32> to vector<1x64xf32>
    %155 = vector.broadcast %150 : vector<16x1xf32> to vector<16x64xf32>
    %156 = vector.broadcast %154 : vector<1x64xf32> to vector<16x64xf32>
    %157 = arith.mulf %155, %156 : vector<16x64xf32>
    %158 = arith.addf %153, %157 : vector<16x64xf32>
    %159 = vector.broadcast %151 : vector<16x1xf32> to vector<16x64xf32>
    %160 = arith.mulf %159, %158 : vector<16x64xf32>
    %cst_52 = arith.constant dense<0.000000e+00> : vector<64xf32>
    %161 = vector.multi_reduction <add>, %160, %cst_52 [0] : vector<16x64xf32> to vector<64xf32>
    %162 = vector.shape_cast %161 : vector<64xf32> to vector<1x64xf32>
    %163 = vector.extract_strided_slice %79 {offsets = [0, 3], sizes = [16, 1], strides = [1, 1]} : vector<32x8xf32> to vector<16x1xf32>
    %164 = vector.extract_strided_slice %79 {offsets = [16, 3], sizes = [16, 1], strides = [1, 1]} : vector<32x8xf32> to vector<16x1xf32>
    %165 = vector.extract_strided_slice %122 {offsets = [48, 0], sizes = [16, 64], strides = [1, 1]} : vector<128x64xf32> to vector<16x64xf32>
    %166 = arith.mulf %165, %158 : vector<16x64xf32>
    %167 = vector.extract_strided_slice %94 {offsets = [3, 0], sizes = [1, 64], strides = [1, 1]} : vector<8x64xf32> to vector<1x64xf32>
    %168 = vector.broadcast %163 : vector<16x1xf32> to vector<16x64xf32>
    %169 = vector.broadcast %167 : vector<1x64xf32> to vector<16x64xf32>
    %170 = arith.mulf %168, %169 : vector<16x64xf32>
    %171 = arith.addf %166, %170 : vector<16x64xf32>
    %172 = vector.broadcast %164 : vector<16x1xf32> to vector<16x64xf32>
    %173 = arith.mulf %172, %171 : vector<16x64xf32>
    %cst_53 = arith.constant dense<0.000000e+00> : vector<64xf32>
    %174 = vector.multi_reduction <add>, %173, %cst_53 [0] : vector<16x64xf32> to vector<64xf32>
    %175 = vector.shape_cast %174 : vector<64xf32> to vector<1x64xf32>
    %176 = vector.extract_strided_slice %79 {offsets = [0, 4], sizes = [16, 1], strides = [1, 1]} : vector<32x8xf32> to vector<16x1xf32>
    %177 = vector.extract_strided_slice %79 {offsets = [16, 4], sizes = [16, 1], strides = [1, 1]} : vector<32x8xf32> to vector<16x1xf32>
    %178 = vector.extract_strided_slice %122 {offsets = [64, 0], sizes = [16, 64], strides = [1, 1]} : vector<128x64xf32> to vector<16x64xf32>
    %179 = arith.mulf %178, %171 : vector<16x64xf32>
    %180 = vector.extract_strided_slice %94 {offsets = [4, 0], sizes = [1, 64], strides = [1, 1]} : vector<8x64xf32> to vector<1x64xf32>
    %181 = vector.broadcast %176 : vector<16x1xf32> to vector<16x64xf32>
    %182 = vector.broadcast %180 : vector<1x64xf32> to vector<16x64xf32>
    %183 = arith.mulf %181, %182 : vector<16x64xf32>
    %184 = arith.addf %179, %183 : vector<16x64xf32>
    %185 = vector.broadcast %177 : vector<16x1xf32> to vector<16x64xf32>
    %186 = arith.mulf %185, %184 : vector<16x64xf32>
    %cst_54 = arith.constant dense<0.000000e+00> : vector<64xf32>
    %187 = vector.multi_reduction <add>, %186, %cst_54 [0] : vector<16x64xf32> to vector<64xf32>
    %188 = vector.shape_cast %187 : vector<64xf32> to vector<1x64xf32>
    %189 = vector.extract_strided_slice %79 {offsets = [0, 5], sizes = [16, 1], strides = [1, 1]} : vector<32x8xf32> to vector<16x1xf32>
    %190 = vector.extract_strided_slice %79 {offsets = [16, 5], sizes = [16, 1], strides = [1, 1]} : vector<32x8xf32> to vector<16x1xf32>
    %191 = vector.extract_strided_slice %122 {offsets = [80, 0], sizes = [16, 64], strides = [1, 1]} : vector<128x64xf32> to vector<16x64xf32>
    %192 = arith.mulf %191, %184 : vector<16x64xf32>
    %193 = vector.extract_strided_slice %94 {offsets = [5, 0], sizes = [1, 64], strides = [1, 1]} : vector<8x64xf32> to vector<1x64xf32>
    %194 = vector.broadcast %189 : vector<16x1xf32> to vector<16x64xf32>
    %195 = vector.broadcast %193 : vector<1x64xf32> to vector<16x64xf32>
    %196 = arith.mulf %194, %195 : vector<16x64xf32>
    %197 = arith.addf %192, %196 : vector<16x64xf32>
    %198 = vector.broadcast %190 : vector<16x1xf32> to vector<16x64xf32>
    %199 = arith.mulf %198, %197 : vector<16x64xf32>
    %cst_55 = arith.constant dense<0.000000e+00> : vector<64xf32>
    %200 = vector.multi_reduction <add>, %199, %cst_55 [0] : vector<16x64xf32> to vector<64xf32>
    %201 = vector.shape_cast %200 : vector<64xf32> to vector<1x64xf32>
    %202 = vector.extract_strided_slice %79 {offsets = [0, 6], sizes = [16, 1], strides = [1, 1]} : vector<32x8xf32> to vector<16x1xf32>
    %203 = vector.extract_strided_slice %79 {offsets = [16, 6], sizes = [16, 1], strides = [1, 1]} : vector<32x8xf32> to vector<16x1xf32>
    %204 = vector.extract_strided_slice %122 {offsets = [96, 0], sizes = [16, 64], strides = [1, 1]} : vector<128x64xf32> to vector<16x64xf32>
    %205 = arith.mulf %204, %197 : vector<16x64xf32>
    %206 = vector.extract_strided_slice %94 {offsets = [6, 0], sizes = [1, 64], strides = [1, 1]} : vector<8x64xf32> to vector<1x64xf32>
    %207 = vector.broadcast %202 : vector<16x1xf32> to vector<16x64xf32>
    %208 = vector.broadcast %206 : vector<1x64xf32> to vector<16x64xf32>
    %209 = arith.mulf %207, %208 : vector<16x64xf32>
    %210 = arith.addf %205, %209 : vector<16x64xf32>
    %211 = vector.broadcast %203 : vector<16x1xf32> to vector<16x64xf32>
    %212 = arith.mulf %211, %210 : vector<16x64xf32>
    %cst_56 = arith.constant dense<0.000000e+00> : vector<64xf32>
    %213 = vector.multi_reduction <add>, %212, %cst_56 [0] : vector<16x64xf32> to vector<64xf32>
    %214 = vector.shape_cast %213 : vector<64xf32> to vector<1x64xf32>
    %215 = vector.extract_strided_slice %79 {offsets = [0, 7], sizes = [16, 1], strides = [1, 1]} : vector<32x8xf32> to vector<16x1xf32>
    %216 = vector.extract_strided_slice %79 {offsets = [16, 7], sizes = [16, 1], strides = [1, 1]} : vector<32x8xf32> to vector<16x1xf32>
    %217 = vector.extract_strided_slice %122 {offsets = [112, 0], sizes = [16, 64], strides = [1, 1]} : vector<128x64xf32> to vector<16x64xf32>
    %218 = arith.mulf %217, %210 : vector<16x64xf32>
    %219 = vector.extract_strided_slice %94 {offsets = [7, 0], sizes = [1, 64], strides = [1, 1]} : vector<8x64xf32> to vector<1x64xf32>
    %220 = vector.broadcast %215 : vector<16x1xf32> to vector<16x64xf32>
    %221 = vector.broadcast %219 : vector<1x64xf32> to vector<16x64xf32>
    %222 = arith.mulf %220, %221 : vector<16x64xf32>
    %223 = arith.addf %218, %222 : vector<16x64xf32>
    %224 = vector.broadcast %216 : vector<16x1xf32> to vector<16x64xf32>
    %225 = arith.mulf %224, %223 : vector<16x64xf32>
    %cst_57 = arith.constant dense<0.000000e+00> : vector<64xf32>
    %226 = vector.multi_reduction <add>, %225, %cst_57 [0] : vector<16x64xf32> to vector<64xf32>
    %227 = vector.shape_cast %226 : vector<64xf32> to vector<1x64xf32>
    %228 = tpu.concatenate %136, %149, %162, %175, %188, %201, %214, %227 in 0 : vector<1x64xf32>, vector<1x64xf32>, vector<1x64xf32>, vector<1x64xf32>, vector<1x64xf32>, vector<1x64xf32>, vector<1x64xf32>, vector<1x64xf32> -> vector<8x64xf32>
    %c0_58 = arith.constant 0 : index
    %c0_59 = arith.constant 0 : index
    %c0_60 = arith.constant 0 : index
    %229 = vector.load %arg12[%c0_58, %c0_59, %c0_60] : memref<1x1x64xf32, #tpu.memory_space<vmem>>, vector<1x1x64xf32>
    %230 = vector.shape_cast %229 : vector<1x1x64xf32> to vector<1x64xf32>
    %231 = vector.broadcast %230 : vector<1x64xf32> to vector<8x64xf32>
    %232 = arith.mulf %73, %231 : vector<8x64xf32>
    %233 = arith.addf %228, %232 : vector<8x64xf32>
    %cst_61 = arith.constant 5.000000e-01 : f32
    %234 = vector.broadcast %cst_61 : f32 to vector<8x64xf32>
    %235 = arith.mulf %234, %35 : vector<8x64xf32>
    %236 = math.tanh %235 : vector<8x64xf32>
    %cst_62 = arith.constant 1.000000e+00 : f32
    %237 = vector.broadcast %cst_62 : f32 to vector<8x64xf32>
    %238 = arith.addf %237, %236 : vector<8x64xf32>
    %cst_63 = arith.constant 5.000000e-01 : f32
    %239 = vector.broadcast %cst_63 : f32 to vector<8x64xf32>
    %240 = arith.mulf %239, %238 : vector<8x64xf32>
    %241 = arith.mulf %35, %240 : vector<8x64xf32>
    %242 = arith.mulf %233, %241 : vector<8x64xf32>
    %c0_64 = arith.constant 0 : index
    %c0_65 = arith.constant 0 : index
    %c0_66 = arith.constant 0 : index
    %243 = vector.load %arg13[%c0_64, %c0_65, %c0_66] : memref<1x64x32xf32, #tpu.memory_space<vmem>>, vector<1x64x32xf32>
    %244 = vector.shape_cast %243 : vector<1x64x32xf32> to vector<64x32xf32>
    %cst_67 = arith.constant dense<0.000000e+00> : vector<8x32xf32>
    %245 = tpu.matmul %242, %244, %cst_67 {dimension_numbers = #tpu.dot_dimension_numbers<[1], [0], [0], [1], [0, 0, 1, 1], [], []>} : vector<8x64xf32>, vector<64x32xf32>, vector<8x32xf32> -> vector<8x32xf32>
    %c0_68 = arith.constant 0 : index
    %c0_69 = arith.constant 0 : index
    %246 = vector.load %arg17[%c0_68, %c0_69] : memref<8x32xf32, #tpu.memory_space<vmem>>, vector<8x32xf32>
    tpu.vector_store %arg17[%c0_68, %c0_69], %245 {strides = array<i32>} : memref<8x32xf32, #tpu.memory_space<vmem>>, vector<8x32xf32>,
    %c1_i32 = arith.constant 1 : i32
    %247 = arith.cmpi eq, %arg1, %c1_i32 : i32
    %248 = arith.extui %247 : i1 to i32
    %c0_i32_70 = arith.constant 0 : i32
    %249 = arith.cmpi ne, %248, %c0_i32_70 : i32
    scf.if %249 {
      %c0_71 = arith.constant 0 : index
      %c0_72 = arith.constant 0 : index
      %250 = vector.load %arg17[%c0_71, %c0_72] : memref<8x32xf32, #tpu.memory_space<vmem>>, vector<8x32xf32>
      %c0_73 = arith.constant 0 : index
      %c0_74 = arith.constant 0 : index
      %251 = vector.load %arg18[%c0_73, %c0_74] : memref<8x32xf32, #tpu.memory_space<vmem>>, vector<8x32xf32>
      %252 = arith.addf %250, %251 : vector<8x32xf32>
      %c0_75 = arith.constant 0 : index
      %c0_76 = arith.constant 0 : index
      %253 = vector.load %arg14[%c0_75, %c0_76] : memref<1x32xf32, #tpu.memory_space<vmem>>, vector<1x32xf32>
      %c0_77 = arith.constant 0 : index
      %c0_78 = arith.constant 0 : index
      %254 = vector.load %arg15[%c0_77, %c0_78] : memref<1x32xf32, #tpu.memory_space<vmem>>, vector<1x32xf32>
      %cst_79 = arith.constant dense<0.000000e+00> : vector<8xf32>
      %255 = vector.multi_reduction <add>, %252, %cst_79 [1] : vector<8x32xf32> to vector<8xf32>
      %256 = vector.shape_cast %255 : vector<8xf32> to vector<8x1xf32>
      %cst_80 = arith.constant 3.200000e+01 : f32
      %257 = vector.broadcast %cst_80 : f32 to vector<8x1xf32>
      %258 = arith.divf %256, %257 : vector<8x1xf32>
      %259 = vector.broadcast %258 : vector<8x1xf32> to vector<8x32xf32>
      %260 = arith.subf %252, %259 : vector<8x32xf32>
      %261 = arith.mulf %260, %260 : vector<8x32xf32>
      %cst_81 = arith.constant dense<0.000000e+00> : vector<8xf32>
      %262 = vector.multi_reduction <add>, %261, %cst_81 [1] : vector<8x32xf32> to vector<8xf32>
      %263 = vector.shape_cast %262 : vector<8xf32> to vector<8x1xf32>
      %cst_82 = arith.constant 3.200000e+01 : f32
      %264 = vector.broadcast %cst_82 : f32 to vector<8x1xf32>
      %265 = arith.divf %263, %264 : vector<8x1xf32>
      %cst_83 = arith.constant 9.99999974E-6 : f32
      %266 = vector.broadcast %cst_83 : f32 to vector<8x1xf32>
      %267 = arith.addf %265, %266 : vector<8x1xf32>
      %268 = math.rsqrt %267 : vector<8x1xf32>
      %269 = vector.broadcast %268 : vector<8x1xf32> to vector<8x32xf32>
      %270 = arith.mulf %260, %269 : vector<8x32xf32>
      %271 = vector.broadcast %253 : vector<1x32xf32> to vector<8x32xf32>
      %272 = arith.mulf %270, %271 : vector<8x32xf32>
      %273 = vector.broadcast %254 : vector<1x32xf32> to vector<8x32xf32>
      %274 = arith.addf %272, %273 : vector<8x32xf32>
      %c0_84 = arith.constant 0 : index
      %c0_85 = arith.constant 0 : index
      %c0_86 = arith.constant 0 : index
      %275 = vector.load %arg16[%c0_84, %c0_85, %c0_86] : memref<1x8x32xf32, #tpu.memory_space<vmem>>, vector<1x8x32xf32>
      %276 = vector.shape_cast %275 : vector<1x8x32xf32> to vector<8x32xf32>
      %277 = vector.shape_cast %274 : vector<8x32xf32> to vector<1x8x32xf32>
      tpu.vector_store %arg16[%c0_84, %c0_85, %c0_86], %277 {strides = array<i32>} : memref<1x8x32xf32, #tpu.memory_space<vmem>>, vector<1x8x32xf32>,
    } else {
    }
    return
  }
  func.func @transform_0(%arg0: i32, %arg1: i32) -> (i32, i32, i32) {
    %c0_i32 = arith.constant 0 : i32
    %c0_i32_0 = arith.constant 0 : i32
    %c0_i32_1 = arith.constant 0 : i32
    return %arg0, %c0_i32, %c0_i32_0 : i32, i32, i32
  }
  func.func @transform_1(%arg0: i32, %arg1: i32) -> (i32, i32, i32) {
    %c0_i32 = arith.constant 0 : i32
    %c0_i32_0 = arith.constant 0 : i32
    %c0_i32_1 = arith.constant 0 : i32
    return %arg1, %c0_i32, %c0_i32_0 : i32, i32, i32
  }
  func.func @transform_2(%arg0: i32, %arg1: i32) -> (i32, i32, i32) {
    %c0_i32 = arith.constant 0 : i32
    %c0_i32_0 = arith.constant 0 : i32
    %c0_i32_1 = arith.constant 0 : i32
    return %arg1, %c0_i32, %c0_i32_0 : i32, i32, i32
  }
  func.func @transform_3(%arg0: i32, %arg1: i32) -> (i32, i32, i32) {
    %c0_i32 = arith.constant 0 : i32
    %c0_i32_0 = arith.constant 0 : i32
    %c0_i32_1 = arith.constant 0 : i32
    return %arg1, %c0_i32, %c0_i32_0 : i32, i32, i32
  }
  func.func @transform_4(%arg0: i32, %arg1: i32) -> (i32, i32, i32) {
    %c0_i32 = arith.constant 0 : i32
    %c0_i32_0 = arith.constant 0 : i32
    %c0_i32_1 = arith.constant 0 : i32
    return %arg1, %c0_i32, %c0_i32_0 : i32, i32, i32
  }
  func.func @transform_5(%arg0: i32, %arg1: i32) -> (i32, i32, i32) {
    %c0_i32 = arith.constant 0 : i32
    %c0_i32_0 = arith.constant 0 : i32
    %c0_i32_1 = arith.constant 0 : i32
    return %arg1, %c0_i32, %c0_i32_0 : i32, i32, i32
  }
  func.func @transform_6(%arg0: i32, %arg1: i32) -> (i32, i32, i32) {
    %c0_i32 = arith.constant 0 : i32
    %c0_i32_0 = arith.constant 0 : i32
    %c0_i32_1 = arith.constant 0 : i32
    return %arg1, %c0_i32, %c0_i32_0 : i32, i32, i32
  }
  func.func @transform_7(%arg0: i32, %arg1: i32) -> (i32, i32, i32) {
    %c0_i32 = arith.constant 0 : i32
    %c0_i32_0 = arith.constant 0 : i32
    %c0_i32_1 = arith.constant 0 : i32
    return %arg1, %c0_i32, %c0_i32_0 : i32, i32, i32
  }
  func.func @transform_8(%arg0: i32, %arg1: i32) -> (i32, i32, i32) {
    %c0_i32 = arith.constant 0 : i32
    %c0_i32_0 = arith.constant 0 : i32
    %c0_i32_1 = arith.constant 0 : i32
    return %arg1, %c0_i32, %c0_i32_0 : i32, i32, i32
  }
  func.func @transform_9(%arg0: i32, %arg1: i32) -> (i32, i32, i32) {
    %c0_i32 = arith.constant 0 : i32
    %c0_i32_0 = arith.constant 0 : i32
    %c0_i32_1 = arith.constant 0 : i32
    return %arg1, %c0_i32, %c0_i32_0 : i32, i32, i32
  }
  func.func @transform_10(%arg0: i32, %arg1: i32) -> (i32, i32, i32) {
    %c0_i32 = arith.constant 0 : i32
    %c0_i32_0 = arith.constant 0 : i32
    %c0_i32_1 = arith.constant 0 : i32
    return %arg1, %c0_i32, %c0_i32_0 : i32, i32, i32
  }
  func.func @transform_11(%arg0: i32, %arg1: i32) -> (i32, i32, i32) {
    %c0_i32 = arith.constant 0 : i32
    %c0_i32_0 = arith.constant 0 : i32
    %c0_i32_1 = arith.constant 0 : i32
    return %arg1, %c0_i32, %c0_i32_0 : i32, i32, i32
  }
  func.func @transform_12(%arg0: i32, %arg1: i32) -> (i32, i32) {
    %c0_i32 = arith.constant 0 : i32
    %c0_i32_0 = arith.constant 0 : i32
    %c0_i32_1 = arith.constant 0 : i32
    return %c0_i32, %c0_i32_0 : i32, i32
  }
  func.func @transform_13(%arg0: i32, %arg1: i32) -> (i32, i32) {
    %c0_i32 = arith.constant 0 : i32
    %c0_i32_0 = arith.constant 0 : i32
    %c0_i32_1 = arith.constant 0 : i32
    return %c0_i32, %c0_i32_0 : i32, i32
  }
  func.func @transform_14(%arg0: i32, %arg1: i32) -> (i32, i32, i32) {
    %c0_i32 = arith.constant 0 : i32
    %c0_i32_0 = arith.constant 0 : i32
    %c0_i32_1 = arith.constant 0 : i32
    return %arg0, %c0_i32, %c0_i32_0 : i32, i32, i32
  }
}

</mosaic_0001>

<bundles_post_ra>
// kernel: mixer_model_forward.1
= control target key start
LH: loop header
LB: loop body
LE: loop exit
PB: predicated region body
PF: predicated region fallthrough
CT: control target
= control target key end

     0   :  { %s2818_s0 = inlined_call_operand.vmem [shape: f32[2,8,32], index: 0, kind: input, shape index: {}]   ;;  %s2819_s1 = inlined_call_operand.vmem [shape: f32[2,1,32], index: 1, kind: input, shape index: {}]   ;;  %s2820_s2 = inlined_call_operand.vmem [shape: f32[2,1,32], index: 2, kind: input, shape index: {}]   ;;  %s2821_s3 = inlined_call_operand.vmem [shape: f32[2,32,128], index: 3, kind: input, shape index: {}]   ;;  %s2822_s4 = inlined_call_operand.vmem [shape: f32[2,4,64], index: 4, kind: input, shape index: {}]   ;;  %s2823_s5 = inlined_call_operand.vmem [shape: f32[2,1,64], index: 5, kind: input, shape index: {}]   ;;  %s2824_s6 = inlined_call_operand.vmem [shape: f32[2,64,64], index: 6, kind: input, shape index: {}]   ;;  %s2825_s7 = inlined_call_operand.vmem [shape: f32[2,32,64], index: 7, kind: input, shape index: {}]   ;;  %s2826_s8 = inlined_call_operand.vmem [shape: f32[2,1,64], index: 8, kind: input, shape index: {}]   ;;  %s2827_s9 = inlined_call_operand.vmem [shape: f32[2,16,64], index: 9, kind: input, shape index: {}]   ;;  %s2828_s10 = inlined_call_operand.vmem [shape: f32[2,1,64], index: 10, kind: input, shape index: {}]   ;;  %s2829_s11 = inlined_call_operand.vmem [shape: f32[2,64,32], index: 11, kind: input, shape index: {}]   ;;  %s2830_s12 = inlined_call_operand.vmem [shape: f32[1,32], index: 12, kind: input, shape index: {}]   ;;  %s2831_s13 = inlined_call_operand.vmem [shape: f32[1,32], index: 13, kind: input, shape index: {}]   ;;  %s2832_s14 = inlined_call_operand.hbm [shape: f32[2,8,32], index: 14, kind: output, shape index: {}]  }
   0x1   :  { %2848 = sst [smem:[#allocation20_spill]] %s2818_s0 }
   0x2   :  { %2849 = sst [smem:[#allocation21_spill]] %s2821_s3 }
   0x3   :  { %2850 = sst [smem:[#allocation22_spill]] %s2822_s4 }
   0x4   :  { %2851 = sst [smem:[#allocation23_spill]] %s2824_s6 }
   0x5   :  { %2852 = sst [smem:[#allocation24_spill]] %s2830_s12 }
   0x6   :  { %2853 = sst [smem:[#allocation25_spill]] %s2831_s13 }
   0x7   :  { %2854 = sst [smem:[#allocation26_spill]] %s2832_s14 }
   0x8   :  { %19 = vsyncpa [#allocation5], 0 }
   0x9   :  { %21 = vsyncpa [#allocation5 + $0x1], 0  ;;  %s2267_s29 = smov 0   ;;  %s2269_s30 = smov 0  }
   0xa   :  { %s2271_s15 = smov 0   ;;  %s2273_s16 = smov 0  }
   0xb   :  { %s2275_s17 = smov 0   ;;  %s2277_s18 = smov 0  }
   0xc   :  { %s2279_s19 = smov 0   ;;  %s2281_s20 = smov 0  }
   0xd LB: > { %2855 = sst [smem:[#allocation7_spill]] %s2148_s29  ;;  %s1764_s21 = sadd.s32 4294967295, %s2176_s20   ;;  %s2176_s20 = sphi %s2281_s20, %s27_s20   ;;  %s2172_s19 = sphi %s2279_s19, %s2895_s19   ;;  %s2168_s18 = sphi %s2277_s18, %s2894_s18   ;;  %s2164_s17 = sphi %s2275_s17, %s2893_s17   ;;  %s2160_s16 = sphi %s2273_s16, %s2892_s16   ;;  %s2156_s15 = sphi %s2271_s15, %s2891_s15   ;;  %s2152_s30 = sphi %s2269_s30, %s2890_s30   ;;  %s2148_s29 = sphi %s2267_s29, %s2889_s29  }
   0xe   : > { %2856 = sst [smem:[#allocation8_spill]] %s2152_s30  ;;  %s1765_s22 = sadd.s32 4294967294, %s2176_s20  }
   0xf   : > { %2857 = sst [smem:[#allocation9_spill]] %s2156_s15  ;;  %s36_s23 = sadd.s32 1, %s2168_s18 }
  0x10   : > { %2858 = sst [smem:[#allocation10_spill]] %s2160_s16  ;;  %p37_p0 = scmp.ge.s32.totalorder %s36_s23, 2 }
  0x11   : > { %2859 = sst [smem:[#allocation11_spill]] %s2164_s17  ;;  %s39_s24 = sadd.s32 1, %s2172_s19 }
  0x12   : > { %2860 = sst [smem:[#allocation12_spill]] %s2168_s18  ;;  %p410_p1 = scmp.ne.s32.totalorder %s2156_s15, %s2152_s30 }
  0x13   : > { %2861 = sst [smem:[#allocation13_spill]] %s2172_s19  ;;  %p411_p2 = scmp.eq.s32.totalorder %s1764_s21, 3 }
  0x14   : > { %2862 = sst [smem:[#allocation14_spill]] %s2176_s20  ;;  %s2897_s23 = smov (%p37_p0, %s36_s23), 0 }
  0x15   : > { %2863 = sst [smem:[#allocation15_spill]] %s2897_s23  ;;  %s2899_s24 = smov (!%p37_p0, %s39_s24), %s2172_s19 }
  0x16   : > { %p2316_p3 = por %p411_p2, %p410_p1  ;;  %p416_p4 = scmp.ne.s32.totalorder %s2152_s30, %s2148_s29 }
  0x17   : > { %p41_p5 = scmp.ge.s32.totalorder %s2899_s24, 2  ;;  %p417_p6 = scmp.eq.s32.totalorder %s1765_s22, 3 }
  0x18   : > { %s2864_s25 = scalar_select %p2316_p3, 1, 0 }
  0x19   : > { %p1768_p7 = scmp.ge.s32.totalorder %s2176_s20, 1  ;;  %p525_p8 = scmp.lt.s32.totalorder %s2176_s20, 5 }
  0x1a   : > { %2865 = sst [smem:[#allocation16_spill]] %s2864_s25  ;;  %s2901_s24 = smov (%p41_p5, %s2899_s24), 0 }
  0x1b   : > { %2866 = sst [smem:[#allocation17_spill]] %s2901_s24  ;;  %p2326_p9 = por %p417_p6, %p416_p4 }
  0x1c   : > { %p526_p10 = pnand %p1768_p7, %p525_p8  ;;  %s397_s27 = ssub.s32 %s2172_s19, %s2901_s24 }
  0x1d   : > { %s2867_s26 = scalar_select %p2326_p9, 1, 0 }
  0x1e   : > { %s400_s28 = sadd.s32 1, %s2156_s15  ;;  %p398_p11 = scmp.eq.s32.totalorder %s397_s27, 0 }
  0x1f   : > { %2868 = sst [smem:[#allocation18_spill]] %s2867_s26  ;;  %529 = sbr.rel (%p526_p10) target bundleno = 1666 (0x682), region = 76 }
  0x20   : > { %s2334_s21 = scalar_select %p398_p11, %s2156_s15, %s400_s28  }
  0x21   : > { %s2837_s22 = sand.u32 (!%p526_p10), 1, %s2152_s30   ;;  %p614_p12 = scmp.lt.s32.totalorder (!%p526_p10), %s2164_s17, 1 }
  0x22   : > { %2869 = sst [smem:[#allocation19_spill]] %s2334_s21  ;;  %s2340_s23 = sshll.u32 (!%p526_p10), %s2837_s22, 3 }
  0x23   : > { %p618_p13 = scmp.lt.s32.totalorder (!%p526_p10), %s2160_s16, 1  ;;  %s2870_s0 = sld [smem:[#allocation20_spill]] (!%p526_p10) }
  0x24   : > { %s2871_s3 = sld [smem:[#allocation21_spill]] (!%p526_p10)  ;;  %s2872_s4 = sld [smem:[#allocation22_spill]] (!%p526_p10) }
  0x25   : > { %s2873_s6 = sld [smem:[#allocation23_spill]] (!%p526_p10)  ;;  %s613_s30 = scalar_lea.vmem (!%p526_p10), [#allocation4], %s2340_s23 }
  0x26   : > { %s615_s18 = scalar_select %p614_p12, %s2164_s17, 1 }
  0x27   : > { %s2345_s26 = scalar_select %p618_p13, %s2160_s16, 1 }
  0x28   : > { %s1770_s27 = sshll.u32 %s615_s18, 3 }
  0x29   : > { %s617_s19 = scalar_lea.vmem %s2870_s0, %s1770_s27  ;;  %s1803_s25 = sshll.u32 %s2345_s26, 5 }
  0x2a   : > { %s2362_s13 = scalar_lea.vmem %s2871_s3, %s1803_s25  ;;  %s1773_s18 = sshll.u32 %s2345_s26, 2 }
  0x2b   : > { %s2368_s24 = scalar_lea.vmem %s2872_s4, %s1773_s18  ;;  %s1804_s28 = sshll.u32 %s2345_s26, 6 }
  0x2c   : > { %s2378_s20 = scalar_lea.vmem %s2825_s7, %s1803_s25  ;;  %s2383_s17 = scalar_lea.vmem %s2873_s6, %s1804_s28 }
  0x2d   : > { %s648_s12 = scalar_lea.vmem %s2826_s8, %s2345_s26  ;;  %s1806_s16 = sshll.u32 %s2345_s26, 4 }
  0x2e   : > { %s656_s27 = scalar_lea.vmem %s2828_s10, %s2345_s26  ;;  %s2397_s15 = scalar_lea.vmem %s2827_s9, %s1806_s16 }
  0x2f   : > { %s2402_s14 = scalar_lea.vmem %s2829_s11, %s1804_s28  ;;  %s2874_s6 = sld [smem:[#allocation10_spill]] }
  0x35   : > { %p1782_p0 = scmp.ne.s32.totalorder %s2874_s6, 0 }
  0x36   : > { %v666_v0 = vld [vmem:[%s617_s19] sm:$0xff] (!%p1782_p0)  ;;  %vm667_vm0 = vcmask (!%p1782_p0), 261120   ;;  %v2178_v1 = vmov (!%p1782_p0), 0.0  }
  0x37   : > { %665 = sbr.rel (%p1782_p0) target bundleno = 62 (0x3e), region = 80  ;;  %668 = vst.msk [vmem:[#allocation2] sm:$0xff] (!%p1782_p0), %vm667_vm0, %v666_v0  ;;  %669 = vst.msk [vmem:[#allocation3] sm:$0xff] (!%p1782_p0), %vm667_vm0, %v2178_v1 }
  0x3e PF: > { %v670_v2 = vld [vmem:[#allocation2] sm:$0xff]  ;;  %v671_v3 = vld [vmem:[#allocation3] sm:$0xff]  ;;  %vm673_vm1 = vcmask 261120   ;;  %v707_v13 = vld [vmem:[%s2362_s13 + $0x10] sm:$0xff]  ;;  %v2179_v14 = vmov 0.0|0.0   ;;  %vm2180_vm2 = vmmov 0   ;;  %s2875_s4 = scalar_lea.vmem %s2819_s1, %s2345_s26  ;;  %s2876_s19 = scalar_lea.vmem %s2820_s2, %s2345_s26  ;;  %v783_v31 = vlaneseq }
  0x3f   : > { %v672_v4 = vadd.f32 %v671_v3, %v670_v2  ;;  %v705_v11 = vld [vmem:[%s2362_s13] sm:$0xff]  ;;  %v706_v12 = vld [vmem:[%s2362_s13 + $0x8] sm:$0xff]  ;;  %1893 = vmatprep.subr.bf16.mxu0 %v2179_v14  ;;  %v708_v16 = vld [vmem:[%s2362_s13 + $0x18] sm:$0xff]  ;;  %v2181_v17 = vmov 0.0   ;;  %vm844_vm3 = vcmask 523264   ;;  %v2182_v29 = vmov 7   ;;  %s2877_s16 = scalar_lea.vmem %s2823_s5, %s2345_s26 }
  0x40   : > { %v1894_v15 = vpack.c.bf16 %v706_v12, %v705_v11  ;;  %1844 = vmatprep.mubr.msk.f32.mxu0 %vm2180_vm2, %v2181_v17  ;;  %v1897_v18 = vpack.c.bf16 %v708_v16, %v707_v13  ;;  %v1783_v23 = vld [vmem:[%s2875_s4] ss:$0 sm:$0xff]  ;;  %2014 = vset.pattern.permute.xlu0 %v2182_v29  ;;  %v2183_v30 = vmov 0   ;;  %v2435_v32 = vshrl.u32 %v783_v31, 7  ;;  %v833_v1 = vld [vmem:[%s2383_s17 + $0x8] sm:$0xff]  ;;  %v838_v12 = vld [vmem:[%s2383_s17 + $0x30] sm:$0xff] }
  0x41   : > { %v677_v5 = vsel %vm673_vm1, %v672_v4, 0.0  ;;  %674 = vst.msk [vmem:[#allocation3] sm:$0xff] %vm673_vm1, %v672_v4  ;;  %v1784_v25 = vld [vmem:[%s2876_s19] ss:$0 sm:$0xff]  ;;  %2007 = vset.pattern.permute.xlu1 %v2183_v30  ;;  %vm799_vm4 = vcmask 1040384   ;;  %vm809_vm5 = vcmask 1041408  }
  0x42   : > { %678 = vadd.xlane.f32.xlu0 %v677_v5  ;;  %1895 = vmatpush3.bf16.msra.mxu0 %v1894_v15  ;;  %v840_v28 = vld [vmem:[%s2378_s20] sm:$0xff]  ;;  %v2438_v33 = vsub.s32 3, %v2435_v32  ;;  %v2442_v35 = vsub.s32 2, %v2435_v32  ;;  %v2446_v37 = vsub.s32 1, %v2435_v32  ;;  %v2457_v41 = vsub.s32 0, %v2435_v32  ;;  %v841_v2 = vld [vmem:[%s2378_s20 + $0x8] sm:$0xff] }
  0x43   : > { %1896 = vmatprep.subr.bf16.mxu0 %v2179_v14  ;;  %1849 = vmatprep.mubr.msk.f32.mxu1 %vm844_vm3, %v840_v28  ;;  %v782_v34 = vld [vmem:[%s2368_s24] sm:$0xf]  ;;  %vm819_vm6 = vcmask 1042432   ;;  %v835_v5 = vld [vmem:[%s2383_s17 + $0x18] sm:$0xff]  ;;  %v2188_v28 = vmov 5   ;;  %s2190_s24 = smov 64  }
  0x44   : > { %v786_v36 = vrot.slane %v782_v34, %v2438_v33  ;;  %v1786_v39 = vld [vmem:[%s2877_s16] ss:$0 sm:$0xff]  ;;  %v804_v40 = vrot.slane %v782_v34, %v2442_v35  ;;  %v814_v47 = vrot.slane %v782_v34, %v2446_v37  ;;  %v824_v52 = vrot.slane %v782_v34, %v2457_v41  ;;  %v839_v13 = vld [vmem:[%s2383_s17 + $0x38] sm:$0xff]  ;;  %s2878_s21 = sld [smem:[#allocation10_spill]] }
  0x45   : > { %v832_v0 = vld [vmem:[%s2383_s17] sm:$0xff]  ;;  %v1909_v15 = vpack.c.bf16 %v839_v13, %v838_v12  ;;  %vm1417_vm7 = vcmask 1043456   ;;  %vm1419_vm8 = vcmask 1044480   ;;  %vm1421_vm9 = vcmask 1045504  }
  0x46   : > { %1898 = vmatpush3.bf16.msra.mxu0 %v1897_v18  ;;  %v1900_v3 = vpack.c.bf16 %v833_v1, %v832_v0  ;;  %vm1423_vm10 = vcmask 1046528  }
  0x47   : > { %1911 = vmatprep.subr.bf16.mxu0 %v2179_v14 }
  0x4a   : > { %p1796_p1 = scmp.ne.s32.totalorder %s2878_s21, 1 }
  0xcf   : > { %v679_v6 = vpop.xlane.xlu0 %678 }
  0xd0   : > { %v681_v7 = vmul.f32 0.03125, %v679_v6  ;;  %v842_v6 = vld [vmem:[%s2378_s20 + $0x10] sm:$0xff] }
  0xd2   : > { %v682_v8 = vsub.f32 %v672_v4, %v681_v7  ;;  %v834_v4 = vld [vmem:[%s2383_s17 + $0x10] sm:$0xff] }
  0xd3   : > { %v1903_v7 = vpack.c.bf16 %v835_v5, %v834_v4 }
  0xd4   : > { %v683_v9 = vmul.f32 %v682_v8, %v682_v8 }
  0xd6   : > { %v684_v10 = vsel %vm673_vm1, %v683_v9, 0.0  ;;  %v836_v9 = vld [vmem:[%s2383_s17 + $0x20] sm:$0xff] }
  0xd7   : > { %685 = vadd.xlane.f32.xlu0 %v684_v10  ;;  %v837_v10 = vld [vmem:[%s2383_s17 + $0x28] sm:$0xff] }
  0xd8   : > { %v1906_v11 = vpack.c.bf16 %v837_v10, %v836_v9 }
 0x164   : > { %v686_v19 = vpop.xlane.xlu0 %685 }
 0x165   : > { %v687_v20 = vmul.f32 0.03125, %v686_v19 }
 0x167   : > { %v688_v21 = vadd.f32 1e-05, %v687_v20  ;;  %v2184_v20 = vmov 1  }
 0x169   : > { %2038 = vrsqrt.f32 %v688_v21 }
 0x173   : > { %v2039_v22 = vpop.eup %2038 }
 0x174   : > { %v690_v24 = vmul.f32 %v2039_v22, %v682_v8  ;;  %v843_v8 = vld [vmem:[%s2378_s20 + $0x18] sm:$0xff]  ;;  %v2185_v22 = vmov 2  }
 0x176   : > { %v697_v26 = vmul.f32 %v1783_v23, %v690_v24  ;;  %v2186_v23 = vmov 3  }
 0x178   : > { %v704_v27 = vadd.f32 %v1784_v25, %v697_v26  ;;  %v2187_v26 = vmov 4  }
 0x17a   : > { %1845 = vmatmul.mubr.msk.f32.vlgmr.msra.gmra.mrb[0].mxu0 %vm673_vm1, %v704_v27 }
 0x17b   : > { %1890 = vmatprep.mubr.msk.f32.mxu0 %vm2180_vm2, %v2181_v17 }
 0x24d   : > { %v2448_v38 = vpop.f32.mrb[0].mxu0 }
 0x24e   : > { %v787_v42 = vmul.f32 %v786_v36, %v2448_v38  ;;  %v797_v43 = vrot.slane %v2448_v38, 7  ;;  %v807_v44 = vrot.slane %v2448_v38, 6  ;;  %v817_v45 = vrot.slane %v2448_v38, 5  ;;  %v1846_v46 = vpop.f32.mrb[1].mxu0 }
 0x24f   : > { %v1434_v21 = vmul.f32 0.5, %v2448_v38  ;;  %v2189_v36 = vmov 6  }
 0x250   : > { %v795_v48 = vadd.f32 %v1786_v39, %v787_v42  ;;  %v800_v49 = vsel %vm799_vm4, 0.0, %v797_v43  ;;  %v810_v50 = vsel %vm809_vm5, 0.0, %v807_v44  ;;  %v820_v53 = vsel %vm819_vm6, 0.0, %v817_v45 }
 0x251   : > { %v805_v51 = vmul.f32 %v804_v40, %v800_v49  ;;  %v815_v55 = vmul.f32 %v814_v47, %v810_v50  ;;  %v825_v56 = vmul.f32 %v824_v52, %v820_v53  ;;  %v1792_v40 = vld [vmem:[%s648_s12] ss:$0 sm:$0xff] }
 0x253   : > { %v806_v54 = vadd.f32 %v805_v51, %v795_v48  ;;  %v2542_v51 = vld [vmem:[%s2397_s15 + $0x8] sm:$0xff] }
 0x255   : > { %v816_v57 = vadd.f32 %v815_v55, %v806_v54 }
 0x257   : > { %v826_v58 = vadd.f32 %v825_v56, %v816_v57 }
 0x259   : > { %v827_v59 = vmul.f32 0.5, %v826_v58 }
 0x25b   : > { %2040 = vtanh.f32 %v827_v59 }
 0x25c   : > { %2042 = vtanh.f32 %v1434_v21 }
 0x265   : > { %v2041_v60 = vpop.eup %2040 }
 0x266   : > { %v829_v61 = vadd.f32 1.0, %v2041_v60  ;;  %v2043_v27 = vpop.eup %2042  ;;  %v1060_v60 = vsub.s32 4, %v2435_v32 }
 0x267   : > { %v1436_v31 = vadd.f32 1.0, %v2043_v27 }
 0x268   : > { %v830_v62 = vmul.f32 0.5, %v829_v61 }
 0x269   : > { %v1437_v34 = vmul.f32 0.5, %v1436_v31 }
 0x26a   : > { %v2468_v63 = vmul.f32 %v830_v62, %v826_v58 }
 0x26b   : > { %v1438_v39 = vmul.f32 %v1437_v34, %v2448_v38  ;;  %v1447_v34 = vld [vmem:[%s2402_s14 + $0x18] sm:$0xff] }
 0x26c   : > { %1847 = vmatprep.subr.msk.mxu1 %vm844_vm3, %v2468_v63 }
 0x26d   : > { %1848 = vmatpush3.xpose.msk.msra.mxu1 %vm844_vm3, %v2468_v63 }
 0x26e   : > { %1899 = vmatprep.subr.bf16.mxu1 %v2179_v14 }
 0x270   : > { %1850 = vmatmul.mubr.msk.f32.vlgmr.msra.gmra.mrb[0].mxu1 %vm844_vm3, %v841_v2  ;;  %v1066_v2 = vsub.s32 5, %v2435_v32 }
 0x271   : > { %1901 = vmatpush3.bf16.msra.mxu1 %v1900_v3  ;;  %1852 = vmatprep.mubr.msk.f32.mxu1 %vm844_vm3, %v842_v6 }
 0x272   : > { %1902 = vmatprep.subr.bf16.mxu1 %v2179_v14 }
 0x274   : > { %1853 = vmatmul.mubr.msk.f32.gmra.mrb[2].mxu1 %vm844_vm3, %v843_v8 }
 0x275   : > { %1904 = vmatpush3.bf16.msra.mxu1 %v1903_v7  ;;  %1871 = vmatprep.mubr.msk.f32.mxu1 %vm2180_vm2, %v2181_v17 }
 0x276   : > { %1905 = vmatprep.subr.bf16.mxu1 %v2179_v14 }
 0x279   : > { %1907 = vmatpush3.bf16.msra.mxu1 %v1906_v11 }
 0x27a   : > { %1908 = vmatprep.subr.bf16.mxu1 %v2179_v14 }
 0x27d   : > { %1910 = vmatpush3.bf16.msra.mxu1 %v1909_v15 }
 0x280   : > { %1872 = vmatmul.mubr.msk.f32.vlgmr.msra.gmra.mrb[4].mxu1 %vm844_vm3, %v2468_v63 }
 0x343   : > { %v1851_v16 = vpop.f32.mrb[0].mxu1 }
 0x344   : > { %1384 = vperm.xlu0 %2014, %v1851_v16   ;;  %1123 = vperm.xlu1 %2007, %v1851_v16   ;;  %v926_v18 = vpop.f32.mrb[1].mxu1 }
 0x347   : > { %v2496_v19 = vpop.f32.mrb[2].mxu1 }
 0x348   : > { %2016 = vset.pattern.permute.xlu0 %v2184_v20  ;;  %2008 = vset.pattern.permute.xlu1 %v2184_v20  ;;  %v2500_v17 = vpop.f32.mrb[3].mxu1 }
 0x349   : > { %1162 = vperm.xlu1 %2008, %v1851_v16   ;;  %1158 = vperm.xlu0 %2016, %v926_v18  }
 0x34d   : > { %2009 = vset.pattern.permute.xlu1 %v2185_v22  ;;  %1178 = vperm.xlu0 %2016, %v2496_v19  }
 0x34e   : > { %1199 = vperm.xlu1 %2009, %v1851_v16  }
 0x351   : > { %2028 = vset.pattern.permute.xlu0 %v2183_v30 }
 0x352   : > { %2010 = vset.pattern.permute.xlu1 %v2186_v23  ;;  %1136 = vperm.xlu0 %2028, %v2500_v17  }
 0x353   : > { %1236 = vperm.xlu1 %2010, %v1851_v16   ;;  %v1018_v24 = vpop.f32.mrb[4].mxu1 }
 0x354   : > { %v1873_v25 = vpop.f32.mrb[5].mxu1  ;;  %v1019_v42 = vadd.f32 %v1792_v40, %v1018_v24  ;;  %v1445_v24 = vld [vmem:[%s2402_s14 + $0x8] sm:$0xff] }
 0x355   : > { %v1446_v25 = vld [vmem:[%s2402_s14 + $0x10] sm:$0xff] }
 0x356   : > { %2031 = vset.pattern.permute.xlu0 %v2186_v23  ;;  %v1023_v38 = vand.u32 2147483647, %v1019_v42  ;;  %v1022_v48 = vmax.f32 %v1019_v42, 0.0  ;;  %v1915_v40 = vpack.c.bf16 %v1447_v34, %v1446_v25 }
 0x357   : > { %2011 = vset.pattern.permute.xlu1 %v2187_v26  ;;  %1248 = vperm.xlu0 %2031, %v2500_v17  }
 0x358   : > { %1273 = vperm.xlu1 %2011, %v1851_v16   ;;  %v1024_v43 = vsub.f32 0.0, %v1023_v38  ;;  %v1448_v38 = vld [vmem:[%s2402_s14 + $0x20] sm:$0xff] }
 0x35a   : > { %v1025_v44 = vmul.f32 1.442695, %v1024_v43  ;;  %v1449_v43 = vld [vmem:[%s2402_s14 + $0x28] sm:$0xff] }
 0x35b   : > { %2033 = vset.pattern.permute.xlu0 %v2188_v28 }
 0x35c   : > { %2012 = vset.pattern.permute.xlu1 %v2188_v28  ;;  %1322 = vperm.xlu0 %2033, %v2500_v17   ;;  %2044 = vpow2.f32 %v1025_v44 }
 0x35d   : > { %1310 = vperm.xlu1 %2012, %v1851_v16  }
 0x360   : > { %2034 = vset.pattern.permute.xlu0 %v2189_v36 }
 0x361   : > { %2013 = vset.pattern.permute.xlu1 %v2189_v36  ;;  %1363 = vperm.xlu0 %2034, %v2496_v19  }
 0x362   : > { %1347 = vperm.xlu1 %2013, %v1851_v16  }
 0x365   : > { %1440 = vrot.lane.b32.xlu0 %v1438_v39, %s2190_s24 }
 0x366   : > { %2015 = vset.pattern.permute.xlu1 %v2183_v30  ;;  %2037 = vset.pattern.permute.xlu0 %v2182_v29  ;;  %v2045_v45 = vpop.eup %2044 }
 0x367   : > { %1118 = vperm.xlu1 %2015, %v926_v18   ;;  %v1027_v46 = vadd.f32 1.0, %v2045_v45 }
 0x369   : > { %2046 = vlog2.f32 %v1027_v46 }
 0x36b   : > { %2017 = vset.pattern.permute.xlu1 %v2185_v22 }
 0x36c   : > { %1195 = vperm.xlu1 %2017, %v926_v18  }
 0x370   : > { %2018 = vset.pattern.permute.xlu1 %v2186_v23 }
 0x371   : > { %1232 = vperm.xlu1 %2018, %v926_v18  }
 0x375   : > { %2019 = vset.pattern.permute.xlu1 %v2187_v26 }
 0x376   : > { %1269 = vperm.xlu1 %2019, %v926_v18  }
 0x37a   : > { %2020 = vset.pattern.permute.xlu1 %v2188_v28 }
 0x37b   : > { %1306 = vperm.xlu1 %2020, %v926_v18  }
 0x37f   : > { %2021 = vset.pattern.permute.xlu1 %v2189_v36 }
 0x380   : > { %1343 = vperm.xlu1 %2021, %v926_v18  }
 0x384   : > { %2022 = vset.pattern.permute.xlu1 %v2182_v29 }
 0x385   : > { %1380 = vperm.xlu1 %2022, %v926_v18  }
 0x389   : > { %2023 = vset.pattern.permute.xlu1 %v2183_v30  ;;  %v2047_v30 = vpop.eup %2046 }
 0x38a   : > { %1141 = vperm.xlu1 %2023, %v2496_v19   ;;  %v1029_v47 = vmul.f32 0.6931472, %v2047_v30 }
 0x38c   : > { %v2532_v49 = vadd.f32 %v1029_v47, %v1022_v48 }
 0x38e   : > { %2024 = vset.pattern.permute.xlu1 %v2185_v22  ;;  %v2538_v50 = vrot.slane %v2532_v49, %v2457_v41  ;;  %v2549_v53 = vrot.slane %v2532_v49, %v2446_v37  ;;  %v2557_v56 = vrot.slane %v2532_v49, %v2442_v35  ;;  %v2565_v59 = vrot.slane %v2532_v49, %v2438_v33 }
 0x38f   : > { %1215 = vperm.xlu1 %2024, %v2496_v19   ;;  %v2577_v0 = vrot.slane %v2532_v49, %v1060_v60  ;;  %v2590_v9 = vrot.slane %v2532_v49, %v1066_v2 }
 0x390   : > { %v1039_v52 = vmul.f32 %v2538_v50, %v2542_v51  ;;  %v1045_v55 = vmul.f32 %v2549_v53, %v2542_v51  ;;  %v1051_v58 = vmul.f32 %v2557_v56, %v2542_v51  ;;  %v1057_v62 = vmul.f32 %v2565_v59, %v2542_v51 }
 0x391   : > { %v1063_v8 = vmul.f32 %v2577_v0, %v2542_v51 }
 0x392   : > { %v1084_v54 = vmul.f32 1.442695, %v1039_v52  ;;  %v1088_v57 = vmul.f32 1.442695, %v1045_v55  ;;  %v1092_v61 = vmul.f32 1.442695, %v1051_v58  ;;  %v1918_v52 = vpack.c.bf16 %v1449_v43, %v1448_v38 }
 0x393   : > { %2025 = vset.pattern.permute.xlu1 %v2186_v23  ;;  %v1096_v5 = vmul.f32 1.442695, %v1057_v62  ;;  %v1100_v16 = vmul.f32 1.442695, %v1063_v8  ;;  %v1444_v23 = vld [vmem:[%s2402_s14] sm:$0xff]  ;;  %v1451_v55 = vld [vmem:[%s2402_s14 + $0x38] sm:$0xff] }
 0x394   : > { %1252 = vperm.xlu1 %2025, %v2496_v19   ;;  %2048 = vpow2.f32 %v1084_v54  ;;  %v1912_v31 = vpack.c.bf16 %v1445_v24, %v1444_v23  ;;  %v1450_v54 = vld [vmem:[%s2402_s14 + $0x30] sm:$0xff]  ;;  %v2647_v58 = vld [vmem:[%s2397_s15] sm:$0xff]  ;;  %s2879_s15 = sld [smem:[#allocation24_spill]] (!%p1796_p1)  ;;  %s2880_s14 = sld [smem:[#allocation25_spill]] (!%p1796_p1) }
 0x395   : > { %2050 = vpow2.f32 %v1088_v57 }
 0x396   : > { %2052 = vpow2.f32 %v1092_v61  ;;  %1913 = vmatpush3.bf16.msra.mxu0 %v1912_v31 }
 0x397   : > { %2054 = vpow2.f32 %v1096_v5  ;;  %1914 = vmatprep.subr.bf16.mxu0 %v2179_v14 }
 0x398   : > { %2026 = vset.pattern.permute.xlu1 %v2187_v26  ;;  %2056 = vpow2.f32 %v1100_v16 }
 0x399   : > { %1289 = vperm.xlu1 %2026, %v2496_v19  }
 0x39a   : > { %1916 = vmatpush3.bf16.msra.mxu0 %v1915_v40 }
 0x39b   : > { %1917 = vmatprep.subr.bf16.mxu0 %v2179_v14 }
 0x39d   : > { %2027 = vset.pattern.permute.xlu1 %v2188_v28 }
 0x39e   : > { %1326 = vperm.xlu1 %2027, %v2496_v19   ;;  %v2049_v1 = vpop.eup %2048  ;;  %1919 = vmatpush3.bf16.msra.mxu0 %v1918_v52 }
 0x39f   : > { %v1115_v6 = vmul.f32 0.0, %v2049_v1  ;;  %v2051_v11 = vpop.eup %2050  ;;  %1920 = vmatprep.subr.bf16.mxu0 %v2179_v14 }
 0x3a0   : > { %v2053_v21 = vpop.eup %2052 }
 0x3a1   : > { %v2055_v44 = vpop.eup %2054 }
 0x3a2   : > { %2029 = vset.pattern.permute.xlu1 %v2184_v20 }
 0x3a3   : > { %1174 = vperm.xlu1 %2029, %v2500_v17  }
 0x3a7   : > { %2030 = vset.pattern.permute.xlu1 %v2185_v22 }
 0x3a8   : > { %1211 = vperm.xlu1 %2030, %v2500_v17  }
 0x3ac   : > { %2032 = vset.pattern.permute.xlu1 %v2187_v26 }
 0x3ad   : > { %1285 = vperm.xlu1 %2032, %v2500_v17  }
 0x3b1   : > { %2035 = vset.pattern.permute.xlu1 %v2189_v36 }
 0x3b2   : > { %1359 = vperm.xlu1 %2035, %v2500_v17  }
 0x3b6   : > { %2036 = vset.pattern.permute.xlu1 %v2182_v29  ;;  %v2570_v29 = vmul.f32 %v2532_v49, %v2468_v63 }
 0x3b7   : > { %1396 = vperm.xlu1 %2036, %v2500_v17   ;;  %v1078_v17 = vsub.s32 7, %v2435_v32 }
 0x3b8   : > { %v2582_v3 = vrot.slane %v2570_v29, %v2457_v41  ;;  %v1072_v41 = vsub.s32 6, %v2435_v32  ;;  %v2597_v12 = vrot.slane %v2570_v29, %v2446_v37  ;;  %v2613_v22 = vrot.slane %v2570_v29, %v2442_v35 }
 0x3b9   : > { %v2626_v35 = vrot.slane %v2532_v49, %v1078_v17  ;;  %v2635_v45 = vrot.slane %v2570_v29, %v2438_v33  ;;  %v2057_v33 = vpop.eup %2056  ;;  %v2652_v61 = vrot.slane %v2570_v29, %v1060_v60  ;;  %v2664_v60 = vrot.slane %v2570_v29, %v1066_v2 }
 0x3ba   : > { %v2606_v20 = vrot.slane %v2532_v49, %v1072_v41  ;;  %v1044_v2 = vmul.f32 %v2549_v53, %v2647_v58  ;;  %v2682_v25 = vrot.slane %v2570_v29, %v1078_v17  ;;  %v1050_v53 = vmul.f32 %v2557_v56, %v2647_v58 }
 0x3bb   : > { %1400 = vperm.xlu1 %2036, %v2496_v19   ;;  %v1069_v19 = vmul.f32 %v2590_v9, %v2542_v51  ;;  %v1081_v48 = vmul.f32 %v2626_v35, %v2542_v51 }
 0x3bc   : > { %v1075_v39 = vmul.f32 %v2606_v20, %v2542_v51  ;;  %v1090_v17 = vmul.f32 1.442695, %v1050_v53 }
 0x3bd   : > { %v1104_v28 = vmul.f32 1.442695, %v1069_v19  ;;  %v1112_v51 = vmul.f32 1.442695, %v1081_v48 }
 0x3be   : > { %v1108_v47 = vmul.f32 1.442695, %v1075_v39 }
 0x3bf   : > { %2058 = vpow2.f32 %v1104_v28 }
 0x3c0   : > { %2060 = vpow2.f32 %v1108_v47 }
 0x3c1   : > { %2062 = vpow2.f32 %v1112_v51 }
 0x3c3   : > { %v1124_v4 = vpop.permute.xlu1 %1123  ;;  %v1385_v24 = vpop.permute.xlu0 %1384 }
 0x3c4   : > { %v1131_v7 = vmul.f32 %v2582_v3, %v1124_v4  ;;  %v1921_v4 = vpack.c.bf16 %v1451_v55, %v1450_v54  ;;  %v1392_v28 = vmul.f32 %v2682_v25, %v1385_v24  ;;  %v1062_v54 = vmul.f32 %v2577_v0, %v2647_v58 }
 0x3c6   : > { %v2592_v10 = vadd.f32 %v1131_v7, %v1115_v6  ;;  %v1038_v6 = vmul.f32 %v2538_v50, %v2647_v58  ;;  %1922 = vmatpush3.bf16.msra.mxu0 %v1921_v4  ;;  %v2673_v50 = vrot.slane %v2570_v29, %v1072_v41  ;;  %v1086_v41 = vmul.f32 1.442695, %v1044_v2 }
 0x3c7   : > { %v1098_v51 = vmul.f32 1.442695, %v1062_v54  ;;  %v1068_v4 = vmul.f32 %v2590_v9, %v2647_v58 }
 0x3c8   : > { %v1163_v13 = vpop.permute.xlu1 %1162  ;;  %v1156_v15 = vmul.f32 %v2051_v11, %v2592_v10  ;;  %v1082_v16 = vmul.f32 1.442695, %v1038_v6 }
 0x3c9   : > { %v1170_v18 = vmul.f32 %v2597_v12, %v1163_v13  ;;  %v2059_v8 = vpop.eup %2058  ;;  %v1102_v0 = vmul.f32 1.442695, %v1068_v4 }
 0x3ca   : > { %2064 = vpow2.f32 %v1082_v16 }
 0x3cb   : > { %v2609_v37 = vadd.f32 %v1170_v18, %v1156_v15  ;;  %v2061_v18 = vpop.eup %2060  ;;  %2066 = vpow2.f32 %v1086_v41 }
 0x3cc   : > { %2068 = vpow2.f32 %v1090_v17  ;;  %v1074_v17 = vmul.f32 %v2606_v20, %v2647_v58 }
 0x3cd   : > { %v1200_v26 = vpop.permute.xlu1 %1199  ;;  %v1193_v27 = vmul.f32 %v2053_v21, %v2609_v37 }
 0x3ce   : > { %v1207_v36 = vmul.f32 %v2613_v22, %v1200_v26 }
 0x3d0   : > { %v2628_v42 = vadd.f32 %v1207_v36, %v1193_v27  ;;  %v2063_v27 = vpop.eup %2062 }
 0x3d2   : > { %v1237_v46 = vpop.permute.xlu1 %1236  ;;  %v1230_v30 = vmul.f32 %v2055_v44, %v2628_v42  ;;  %v1056_v44 = vmul.f32 %v2565_v59, %v2647_v58 }
 0x3d3   : > { %v1244_v49 = vmul.f32 %v2635_v45, %v1237_v46 }
 0x3d4   : > { %v2065_v39 = vpop.eup %2064  ;;  %v1094_v48 = vmul.f32 1.442695, %v1056_v44  ;;  %v1106_v44 = vmul.f32 1.442695, %v1074_v17 }
 0x3d5   : > { %v2644_v57 = vadd.f32 %v1244_v49, %v1230_v30  ;;  %v1114_v40 = vmul.f32 0.0, %v2065_v39  ;;  %v2067_v46 = vpop.eup %2066  ;;  %v1159_v30 = vpop.permute.xlu0 %1158 }
 0x3d6   : > { %v1169_v52 = vmul.f32 %v2597_v12, %v1159_v30  ;;  %2070 = vpow2.f32 %v1094_v48  ;;  %v2069_v55 = vpop.eup %2068 }
 0x3d7   : > { %v1274_v62 = vpop.permute.xlu1 %1273  ;;  %v1267_v1 = vmul.f32 %v2057_v33, %v2644_v57  ;;  %2072 = vpow2.f32 %v1098_v51 }
 0x3d8   : > { %v1281_v5 = vmul.f32 %v2652_v61, %v1274_v62  ;;  %2074 = vpow2.f32 %v1102_v0 }
 0x3d9   : > { %v1179_v12 = vpop.permute.xlu0 %1178  ;;  %2076 = vpow2.f32 %v1106_v44 }
 0x3da   : > { %v2659_v7 = vadd.f32 %v1281_v5, %v1267_v1 }
 0x3dc   : > { %v1311_v11 = vpop.permute.xlu1 %1310  ;;  %v1304_v13 = vmul.f32 %v2059_v8, %v2659_v7 }
 0x3dd   : > { %v1318_v15 = vmul.f32 %v2664_v60, %v1311_v11 }
 0x3df   : > { %v2668_v14 = vadd.f32 %v1318_v15, %v1304_v13  ;;  %v1137_v13 = vpop.permute.xlu0 %1136 }
 0x3e0   : > { %v2071_v5 = vpop.eup %2070 }
 0x3e1   : > { %v1348_v19 = vpop.permute.xlu1 %1347  ;;  %v1341_v21 = vmul.f32 %v2061_v18, %v2668_v14 }
 0x3e2   : > { %v1355_v23 = vmul.f32 %v2673_v50, %v1348_v19  ;;  %v2073_v19 = vpop.eup %2072 }
 0x3e4   : > { %v2684_v26 = vadd.f32 %v1355_v23, %v1341_v21 }
 0x3e6   : > { %v1119_v31 = vpop.permute.xlu1 %1118  ;;  %v1378_v34 = vmul.f32 %v2063_v27, %v2684_v26 }
 0x3e7   : > { %v1130_v29 = vmul.f32 %v2582_v3, %v1119_v31  ;;  %v2075_v31 = vpop.eup %2074 }
 0x3e8   : > { %v2688_v36 = vadd.f32 %v1392_v28, %v1378_v34  ;;  %v1249_v28 = vpop.permute.xlu0 %1248 }
 0x3e9   : > { %v1132_v38 = vadd.f32 %v1130_v29, %v1114_v40 }
 0x3eb   : > { %v1196_v32 = vpop.permute.xlu1 %1195  ;;  %v1155_v47 = vmul.f32 %v2067_v46, %v1132_v38  ;;  %v1144_v15 = vmul.f32 %v1137_v13, %v1132_v38 }
 0x3ec   : > { %v1206_v62 = vmul.f32 %v2613_v22, %v1196_v32 }
 0x3ed   : > { %v1171_v56 = vadd.f32 %v1169_v52, %v1155_v47  ;;  %v1146_v9 = vsel %vm844_vm3, %v1144_v15, 0.0  ;;  %v1182_v52 = vmul.f32 %v1179_v12, %v2609_v37  ;;  %v2077_v12 = vpop.eup %2076 }
 0x3ef   : > { %v1192_v33 = vmul.f32 %v2069_v55, %v1171_v56 }
 0x3f0   : > { %v1233_v43 = vpop.permute.xlu1 %1232 }
 0x3f1   : > { %v1208_v59 = vadd.f32 %v1206_v62, %v1192_v33  ;;  %v1243_v11 = vmul.f32 %v2635_v45, %v1233_v43  ;;  %v1323_v43 = vpop.permute.xlu0 %1322  ;;  %v1184_v62 = vsel %vm844_vm3, %v1182_v52, 0.0 }
 0x3f3   : > { %v1229_v6 = vmul.f32 %v2071_v5, %v1208_v59 }
 0x3f5   : > { %v1270_v49 = vpop.permute.xlu1 %1269  ;;  %v1245_v16 = vadd.f32 %v1243_v11, %v1229_v6 }
 0x3f6   : > { %v1280_v2 = vmul.f32 %v2652_v61, %v1270_v49 }
 0x3f7   : > { %v1266_v21 = vmul.f32 %v2073_v19, %v1245_v16  ;;  %v1255_v45 = vmul.f32 %v1249_v28, %v1245_v16 }
 0x3f9   : > { %v1282_v41 = vadd.f32 %v1280_v2, %v1266_v21  ;;  %v1257_v32 = vsel %vm844_vm3, %v1255_v45, 0.0 }
 0x3fa   : > { %v1307_v3 = vpop.permute.xlu1 %1306 }
 0x3fb   : > { %v1303_v53 = vmul.f32 %v2075_v31, %v1282_v41  ;;  %v1317_v39 = vmul.f32 %v2664_v60, %v1307_v3 }
 0x3fd   : > { %v1319_v40 = vadd.f32 %v1317_v39, %v1303_v53 }
 0x3ff   : > { %v2699_v1 = vpop.permute.xlu1 %1343  ;;  %v1329_v46 = vmul.f32 %v1323_v43, %v1319_v40  ;;  %v1340_v19 = vmul.f32 %v2077_v12, %v1319_v40 }
 0x401   : > { %v1331_v60 = vsel %vm844_vm3, %v1329_v46, 0.0 }
 0x404   : > { %v2703_v8 = vpop.permute.xlu1 %1380 }
 0x409   : > { %v1142_v22 = vpop.permute.xlu1 %1141 }
 0x40a   : > { %v1145_v18 = vmul.f32 %v1142_v22, %v2592_v10  ;;  %v1354_v22 = vmul.f32 %v2673_v50, %v2699_v1 }
 0x40c   : > { %v1147_v23 = vsel %vm844_vm3, %v1145_v18, 0.0  ;;  %v1356_v1 = vadd.f32 %v1354_v22, %v1340_v19 }
 0x40d   : > { %v1148_v24 = vadd.f32 %v1147_v23, %v1146_v9  ;;  %v1364_v23 = vpop.permute.xlu0 %1363 }
 0x40e   : > { %v1216_v27 = vpop.permute.xlu1 %1215  ;;  %v1367_v28 = vmul.f32 %v1364_v23, %v2684_v26  ;;  %v1391_v26 = vmul.f32 %v2682_v25, %v2703_v8 }
 0x40f   : > { %v1149_v47 = vrot.slane %v1148_v24, 4 }
 0x410   : > { %v1369_v46 = vsel %vm844_vm3, %v1367_v28, 0.0 }
 0x411   : > { %v1150_v54 = vadd.f32 %v1149_v47, %v1148_v24 }
 0x413   : > { %v1253_v34 = vpop.permute.xlu1 %1252  ;;  %v1151_v4 = vrot.slane %v1150_v54, 2 }
 0x414   : > { %v1256_v10 = vmul.f32 %v1253_v34, %v2644_v57  ;;  %v1080_v57 = vmul.f32 %v2626_v35, %v2647_v58  ;;  %v1219_v35 = vmul.f32 %v1216_v27, %v2628_v42 }
 0x415   : > { %v1152_v13 = vadd.f32 %v1151_v4, %v1150_v54 }
 0x416   : > { %v1258_v61 = vsel %vm844_vm3, %v1256_v10, 0.0  ;;  %v1110_v33 = vmul.f32 1.442695, %v1080_v57 }
 0x417   : > { %v1259_v29 = vadd.f32 %v1258_v61, %v1257_v32  ;;  %v1153_v45 = vrot.slane %v1152_v13, 1 }
 0x418   : > { %v1290_v38 = vpop.permute.xlu1 %1289  ;;  %2078 = vpow2.f32 %v1110_v33 }
 0x419   : > { %v1260_v51 = vrot.slane %v1259_v29, 4  ;;  %v1293_v18 = vmul.f32 %v1290_v38, %v2659_v7  ;;  %v1154_v40 = vadd.f32 %v1153_v45, %v1152_v13 }
 0x41b   : > { %v1261_v6 = vadd.f32 %v1260_v51, %v1259_v29  ;;  %v1295_v34 = vsel %vm844_vm3, %v1293_v18, 0.0 }
 0x41d   : > { %v1327_v30 = vpop.permute.xlu1 %1326  ;;  %v1262_v21 = vrot.slane %v1261_v6, 2 }
 0x41e   : > { %v1330_v48 = vmul.f32 %v1327_v30, %v2668_v14 }
 0x41f   : > { %v1263_v7 = vadd.f32 %v1262_v21, %v1261_v6 }
 0x420   : > { %v1332_v49 = vsel %vm844_vm3, %v1330_v48, 0.0 }
 0x421   : > { %v1333_v20 = vadd.f32 %v1332_v49, %v1331_v60  ;;  %v1264_v47 = vrot.slane %v1263_v7, 1 }
 0x422   : > { %v1175_v3 = vpop.permute.xlu1 %1174  ;;  %v2079_v17 = vpop.eup %2078 }
 0x423   : > { %v1181_v55 = vmul.f32 %v1175_v3, %v1171_v56  ;;  %v1334_v37 = vrot.slane %v1333_v20, 4  ;;  %v1221_v56 = vsel %vm844_vm3, %v1219_v35, 0.0  ;;  %v1377_v30 = vmul.f32 %v2079_v17, %v1356_v1 }
 0x425   : > { %v1183_v14 = vsel %vm844_vm3, %v1181_v55, 0.0  ;;  %v1393_v51 = vadd.f32 %v1391_v26, %v1377_v30  ;;  %v1798_v30 = vld [vmem:[%s2880_s14] ss:$0 sm:$0xff] (!%p1796_p1) }
 0x426   : > { %v1185_v58 = vadd.f32 %v1184_v62, %v1183_v14  ;;  %v1265_v62 = vadd.f32 %v1264_v47, %v1263_v7 }
 0x427   : > { %v1212_v5 = vpop.permute.xlu1 %1211 }
 0x428   : > { %v1186_v0 = vrot.slane %v1185_v58, 4  ;;  %v1218_v11 = vmul.f32 %v1212_v5, %v1208_v59  ;;  %v1335_v59 = vadd.f32 %v1334_v37, %v1333_v20 }
 0x42a   : > { %v1187_v15 = vadd.f32 %v1186_v0, %v1185_v58  ;;  %v1220_v16 = vsel %vm844_vm3, %v1218_v11, 0.0  ;;  %v1336_v32 = vrot.slane %v1335_v59, 2 }
 0x42b   : > { %v1222_v42 = vadd.f32 %v1221_v56, %v1220_v16 }
 0x42c   : > { %v1188_v2 = vrot.slane %v1187_v15, 2  ;;  %v1286_v9 = vpop.permute.xlu1 %1285  ;;  %v1337_v49 = vadd.f32 %v1336_v32, %v1335_v59 }
 0x42d   : > { %v1223_v24 = vrot.slane %v1222_v42, 4  ;;  %v1292_v27 = vmul.f32 %v1286_v9, %v1282_v41 }
 0x42e   : > { %v1189_v31 = vadd.f32 %v1188_v2, %v1187_v15  ;;  %v1338_v8 = vrot.slane %v1337_v49, 1 }
 0x42f   : > { %v1224_v53 = vadd.f32 %v1223_v24, %v1222_v42  ;;  %v1294_v50 = vsel %vm844_vm3, %v1292_v27, 0.0  ;;  %v1794_v24 = vld [vmem:[%s656_s27] ss:$0 sm:$0xff] }
 0x430   : > { %v1190_v39 = vrot.slane %v1189_v31, 1  ;;  %v1296_v10 = vadd.f32 %v1295_v34, %v1294_v50  ;;  %v1339_v12 = vadd.f32 %v1338_v8, %v1337_v49  ;;  %v1432_v28 = vmul.f32 %v1794_v24, %v2468_v63  ;;  %v1441_v34 = vpop.permute.xlu0 %1440 }
 0x431   : > { %v1225_v61 = vrot.slane %v1224_v53, 2  ;;  %v1360_v29 = vpop.permute.xlu1 %1359 }
 0x432   : > { %v1191_v38 = vadd.f32 %v1190_v39, %v1189_v31  ;;  %v1297_v41 = vrot.slane %v1296_v10, 4  ;;  %v1366_v43 = vmul.f32 %v1360_v29, %v1356_v1  ;;  %v1531_v39 = vld [vmem:[#allocation3] sm:$0xff] (!%p1796_p1) }
 0x433   : > { %v1226_v44 = vadd.f32 %v1225_v61, %v1224_v53 }
 0x434   : > { %v1414_v48 = vsel %vm799_vm4, %v1154_v40, %v1191_v38  ;;  %v1298_v57 = vadd.f32 %v1297_v41, %v1296_v10  ;;  %v1368_v60 = vsel %vm844_vm3, %v1366_v43, 0.0 }
 0x435   : > { %v1227_v52 = vrot.slane %v1226_v44, 1  ;;  %v1370_v20 = vadd.f32 %v1369_v46, %v1368_v60 }
 0x436   : > { %v1299_v54 = vrot.slane %v1298_v57, 2  ;;  %v1397_v3 = vpop.permute.xlu1 %1396 }
 0x437   : > { %v1228_v55 = vadd.f32 %v1227_v52, %v1226_v44  ;;  %v1371_v33 = vrot.slane %v1370_v20, 4  ;;  %v1403_v35 = vmul.f32 %v1397_v3, %v1393_v51  ;;  %v1797_v44 = vld [vmem:[%s2879_s15] ss:$0 sm:$0xff] (!%p1796_p1) }
 0x438   : > { %v1300_v25 = vadd.f32 %v1299_v54, %v1298_v57 }
 0x439   : > { %v1415_v14 = vsel %vm809_vm5, %v1414_v48, %v1228_v55  ;;  %v1372_v4 = vadd.f32 %v1371_v33, %v1370_v20  ;;  %v1405_v56 = vsel %vm844_vm3, %v1403_v35, 0.0 }
 0x43a   : > { %v1301_v58 = vrot.slane %v1300_v25, 1  ;;  %v1416_v5 = vsel %vm819_vm6, %v1415_v14, %v1265_v62  ;;  %v1401_v6 = vpop.permute.xlu1 %1400 }
 0x43b   : > { %v1373_v0 = vrot.slane %v1372_v4, 2  ;;  %v1404_v11 = vmul.f32 %v1401_v6, %v2688_v36 }
 0x43c   : > { %v1302_v37 = vadd.f32 %v1301_v58, %v1300_v25 }
 0x43d   : > { %v1374_v13 = vadd.f32 %v1373_v0, %v1372_v4  ;;  %v1406_v15 = vsel %vm844_vm3, %v1404_v11, 0.0 }
 0x43e   : > { %v1418_v16 = vsel %vm1417_vm7, %v1416_v5, %v1302_v37  ;;  %v1407_v22 = vadd.f32 %v1406_v15, %v1405_v56 }
 0x43f   : > { %v1375_v18 = vrot.slane %v1374_v13, 1  ;;  %v1420_v42 = vsel %vm1419_vm8, %v1418_v16, %v1339_v12 }
 0x440   : > { %v1408_v19 = vrot.slane %v1407_v22, 4 }
 0x441   : > { %v1376_v21 = vadd.f32 %v1375_v18, %v1374_v13 }
 0x442   : > { %v1409_v2 = vadd.f32 %v1408_v19, %v1407_v22 }
 0x443   : > { %v1422_v9 = vsel %vm1421_vm9, %v1420_v42, %v1376_v21 }
 0x444   : > { %v1410_v23 = vrot.slane %v1409_v2, 2 }
 0x446   : > { %v1411_v36 = vadd.f32 %v1410_v23, %v1409_v2 }
 0x448   : > { %v1412_v59 = vrot.slane %v1411_v36, 1 }
 0x44a   : > { %v1413_v27 = vadd.f32 %v1412_v59, %v1411_v36 }
 0x44c   : > { %v1424_v45 = vsel %vm1423_vm10, %v1422_v9, %v1413_v27 }
 0x44d   : > { %v1433_v31 = vadd.f32 %v1432_v28, %v1424_v45 }
 0x44f   : > { %v1443_v53 = vmul.f32 %v1441_v34, %v1433_v31 }
 0x451   : > { %1891 = vmatmul.mubr.msk.f32.vlgmr.msra.gmra.mrb[2].mxu0 %vm844_vm3, %v1443_v53 }
 0x51f   : > { %1529 = sbr.rel (%p1796_p1) target bundleno = 1641 (0x669), region = 84 }
 0x524   : > { %v1521_v50 = vpop.f32.mrb[2].mxu0 }
 0x525   : > { %1525 = vst.msk [vmem:[#allocation2] sm:$0xff] %vm673_vm1, %v1521_v50  ;;  %v1892_v1 = vpop.f32.mrb[3].mxu0 }
 0x52c   : > { %v1530_v7 = vld [vmem:[#allocation2] sm:$0xff] }
 0x52d   : > { %v1532_v10 = vadd.f32 %v1531_v39, %v1530_v7 }
 0x52f   : > { %v1535_v32 = vsel %vm673_vm1, %v1532_v10, 0.0 }
 0x530   : > { %1536 = vadd.xlane.f32.xlu0 %v1535_v32 }
 0x5bd   : > { %v1537_v63 = vpop.xlane.xlu0 %1536 }
 0x5be   : > { %v1538_v61 = vmul.f32 0.03125, %v1537_v63 }
 0x5c0   : > { %v1539_v29 = vsub.f32 %v1532_v10, %v1538_v61 }
 0x5c2   : > { %v1540_v17 = vmul.f32 %v1539_v29, %v1539_v29 }
 0x5c4   : > { %v1541_v40 = vsel %vm673_vm1, %v1540_v17, 0.0 }
 0x5c5   : > { %1542 = vadd.xlane.f32.xlu0 %v1541_v40 }
 0x652   : > { %v1543_v38 = vpop.xlane.xlu0 %1542 }
 0x653   : > { %v1544_v41 = vmul.f32 0.03125, %v1543_v38 }
 0x655   : > { %v1545_v43 = vadd.f32 1e-05, %v1544_v41 }
 0x657   : > { %2080 = vrsqrt.f32 %v1545_v43 }
 0x661   : > { %v2081_v26 = vpop.eup %2080 }
 0x662   : > { %v1547_v46 = vmul.f32 %v2081_v26, %v1539_v29 }
 0x664   : > { %v1554_v47 = vmul.f32 %v1797_v44, %v1547_v46 }
 0x666   : > { %v1561_v48 = vadd.f32 %v1798_v30, %v1554_v47 }
 0x668   : > { %1562 = vst.msk [vmem:[%s613_s30] sm:$0xff] %vm673_vm1, %v1561_v48 }
 0x669 PF: > { %s2881_s0 = sld [smem:[#allocation11_spill]]  ;;  %s2882_s3 = sld [smem:[#allocation8_spill]] }
 0x66a   : > { %s2884_s22 = sld [smem:[#allocation26_spill]]  ;;  %s1577_s16 = sshll.u32 %s613_s30, 4  ;;  %s1578_s16 = int_to_ptr.vmem [resolvable:$true] %s1577_s16 }
 0x66b   : > { %s2082_s17 = scalar_lea.vmem %s1578_s16, 128  ;;  %s2191_s12 = smov [#allocation4]  }
 0x66c   : > { %p2083_p2 = scmp.ne.s32.totalorder %s1578_s16, %s2082_s17  ;;  %s2086_s18 = sshll.u32 %s2191_s12, 4  ;;  %s2087_s18 = int_to_ptr.vmem [resolvable:$false] %s2086_s18 }
 0x66d   : > { %s2088_s21 = scalar_lea.vmem %s2087_s18, 256  ;;  %p2089_p6 = scmp.lt.s32.totalorder %s1578_s16, %s2087_s18 }
 0x66e   : > { %p2084_p4 = pnand %p2083_p2, %p2316_p3  ;;  %p2090_p7 = scmp.lt.s32.totalorder %s2088_s21, %s2082_s17 }
 0x66f   : > { %s1800_s6 = sshll.u32 %s2881_s0, 7  ;;  %s2885_s24 = sand.u32 1, %s2882_s3  }
 0x670   : > { %s2767_s28 = scalar_lea.hbm %s2884_s22, %s1800_s6  ;;  %s1564_s20 = scalar_lea.sflag [#allocation5], %s2885_s24 }
 0x671   : > { %p2085_p5 = pneg %p2084_p4  ;;  %p2091_p8 = por %p2090_p7, %p2089_p6 }
 0x673   : > { %p2092_p10 = pnand %p2091_p8, %p2085_p5 }
 0x675   : > { %2095 = shalt.err (!%p2092_p10)
}
 0x676   : > { %s2096_s23 = scalar_lea.hbm %s2767_s28, 128  ;;  %s2100_s27 = scalar_lea.hbm %s2884_s22, 256 }
 0x677   : > { %p2097_p11 = scmp.ne.s32.totalorder %s2767_s28, %s2096_s23  ;;  %p2101_p0 = scmp.lt.u32.totalorder %s2767_s28, %s2884_s22 }
 0x678   : > { %p2102_p1 = scmp.lt.u32.totalorder %s2100_s27, %s2096_s23  ;;  %p2104_p4 = scmp.lt.u32.totalorder %s2096_s23, %s2767_s28 }
 0x679   : > { %p2098_p12 = pnand %p2097_p11, %p2316_p3 }
 0x67a   : > { %p2103_p2 = por %p2102_p1, %p2101_p0 }
 0x67b   : > { %p2099_p13 = pneg %p2098_p12 }
 0x67c   : > { %p2105_p5 = por %p2104_p4, %p2103_p2 }
 0x67e   : > { %p2106_p6 = pnand %p2105_p5, %p2099_p13 }
 0x680   : > { %2109 = shalt.err (!%p2106_p6)
}
 0x681   : > { %1923 = dma.vmem_to_hbm [thread:$0]  (%p2316_p3), %s1578_s16, 128, %s2767_s28, %s1564_s20  }
 0x682 PF: > { %s2886_s29 = sld [smem:[#allocation14_spill]]  ;;  %s2887_s14 = sld [smem:[#allocation7_spill]] }
 0x688   : > { %p1929_p7 = scmp.ge.s32.totalorder %s2886_s29, 2  ;;  %s1589_s3 = sand.u32 1, %s2887_s14  }
 0x689   : > { %s1590_s6 = scalar_lea.sflag [#allocation5], %s1589_s3 }
 0x68a   : > { %p1926_p8 = pnand %p1929_p7, %p2326_p9 }
 0x68c   : > { %2143 = dma.done.wait (!%p1926_p8), %s1590_s6, 128  }
 0x68d   : > { %2145 = vsyncadd (!%p1926_p8), %s1590_s6, 4294967168  ;;  %s27_s20 = sadd.s32 1, %s2886_s29   ;;  %s2889_s29 = sld [smem:[#allocation8_spill]] }
 0x68e   : > { %p24_p10 = scmp.ge.s32.totalorder %s27_s20, 6   ;;  %s2890_s30 = sld [smem:[#allocation9_spill]] }
 0x68f   : > { %s2891_s15 = sld [smem:[#allocation19_spill]]  ;;  %s2892_s16 = sld [smem:[#allocation12_spill]] }
 0x690   : > { %s2893_s17 = sld [smem:[#allocation13_spill]]  ;;  %s2894_s18 = sld [smem:[#allocation15_spill]] }
 0x691   : > { %s2895_s19 = sld [smem:[#allocation17_spill]]  ;;  %26 = sbr.rel (!%p24_p10) target bundleno = 13 (0xd), region = 152 }
 0x698   :  { %1595 = vsyncpa [#allocation5], 1 }
 0x699   :  { %1597 = vsyncpa [#allocation5 + $0x1], 1 }

</bundles_post_ra>
